<compile_context>
chip_gen: v6e
topology: v6e:2x2x1
jax: 0.10.0
libtpu: 0.0.40
codegen_flags: <defaults>
</compile_context>

<pallas_src>
import jax
import jax.numpy as jnp
import numpy as np
from jax import lax
from jax.experimental import pallas as pl
from jax.experimental.pallas import tpu as pltpu

K = 3                        # kernel_size
D1, D2 = 2, 3                # dilations of the two convs
P1 = (K // 2) + D1 - 1       # default_conv padding for conv1 -> 2
P2 = (K // 2) + D2 - 1       # default_conv padding for conv2 -> 3
PC = max(P1, P2)             # canvas border (covers both paddings) -> 3
NEG_SLOPE = 1.0              # nn.LeakyReLU(True) quirk: negative_slope == 1.0
VMEM_LIMIT = 32 * 1024 * 1024


def make_dblock_kernel(NC, C, GB, Wc, Lc):
    """Fused (dilated conv -> identity act) x2 on the packed flat canvas.

    Layout: sublane rows = channel-major / image-minor packing (p = c*GB + g),
    lanes = flattened zero-padded canvas (Hc*Wc, padded to Lc).
    """
    # Static flattened-lane offsets of the 9 taps of each conv; tap index
    # t = kh*K + kw matches the packed weight-column table.
    offs1 = [(kh - K // 2) * D1 * Wc + (kw - K // 2) * D1
             for kh in range(K) for kw in range(K)]
    offs2 = [(kh - K // 2) * D2 * Wc + (kw - K // 2) * D2
             for kh in range(K) for kw in range(K)]

    def conv_taps(src, w_all, offsets):
        # src:   (NC, Lc) f32 value (packed canvas / y1, already in vregs)
        # w_all: (NC, K*K*C) f32 value; column t*C + d holds, for row
        #        p = co*GB + g, the weight w[co, (co + d) % C, kh, kw].
        # C partial accumulators (one per channel diagonal) break the serial
        # FMA dependency chain so the scheduler can fill the 4 VALU slots.
        parts = [jnp.zeros((NC, Lc), jnp.float32) for _ in range(C)]
        for t, off in enumerate(offsets):
            # Tap = lane rotation of the flat canvas: patch[:, j] = src[:, j+off]
            # (jnp.roll convention).  Wrap-around only touches lanes that are
            # masked to zero / discarded by the wrapper — see the static
            # asserts in the wrapper.
            lshift = (-off) % Lc
            patch = pltpu.roll(src, shift=lshift, axis=1) if lshift else src
            for d in range(C):
                # Channel diagonal d: input channel ci = (co + d) % C.  With
                # channel-major / image-minor packing this is a sublane
                # rotation by d*GB (XLU) — no cross-sublane broadcasts.
                sshift = (-d * GB) % NC
                pd = pltpu.roll(patch, shift=sshift, axis=0) if sshift else patch
                col = w_all[:, t * C + d:t * C + d + 1]          # (NC, 1)
                parts[d] = parts[d] + pd * col                   # lane-splat FMA
        while len(parts) > 1:                                    # pairwise tree add
            nxt = [parts[i] + parts[i + 1] for i in range(0, len(parts) - 1, 2)]
            if len(parts) & 1:
                nxt.append(parts[-1])
            parts = nxt
        return parts[0]

    def kernel(x_ref, w1_ref, b1_ref, w2_ref, b2_ref, mask_ref, o_ref):
        x_all = x_ref[0]                    # (NC, Lc) packed canvas
        w1_all = w1_ref[...]                # hoisted: one weight load per conv
        w2_all = w2_ref[...]
        mask = mask_ref[...]                # (1, Lc): 1 on the HxW interior

        acc1 = conv_taps(x_all, w1_all, offs1)
        # bias + LeakyReLU(True) (negative_slope == 1.0 -> identity, elided);
        # the mask zeroes the canvas border and the lane tail so conv2 sees a
        # genuinely zero-padded y1.
        y1 = (acc1 + b1_ref[...]) * mask

        acc2 = conv_taps(y1, w2_all, offs2)
        # Border / tail lanes hold don't-care values the wrapper slices away.
        o_ref[0] = (acc2 + b2_ref[...]).astype(o_ref.dtype)

    return kernel


def _pack_weight_cols(w, C, GB):
    """(Cout,Cin,K,K) OIHW -> (GB*C, K*K*C) diagonal column table.

    Entry [p = co*GB + g, t*C + d] = w[co, (co + d) % C, kh, kw], t = kh*K+kw.
    """
    wt = jnp.transpose(w, (2, 3, 0, 1)).reshape(K * K, C, C)      # [t, co, ci]
    co = jnp.arange(C)
    ci_of = (co[None, :] + jnp.arange(C)[:, None]) % C            # [d, co] -> ci
    wd = wt[:, co[None, :], ci_of]                                # [t, d, co]
    wd = jnp.repeat(wd, GB, axis=2)                               # [t, d, p]
    return wd.reshape(K * K * C, C * GB).T.astype(jnp.float32)    # [p, t*C+d]


def _dblock_com_forward_impl(x_nchw, w1, b1, w2, b2):
    """x_nchw: (N,C,H,W).  w*: (Cout,Cin,K,K) PyTorch layout.  b*: (Cout,)."""
    N, C, H, W = x_nchw.shape
    Hc, Wc = H + 2 * PC, W + 2 * PC
    Lraw = Hc * Wc
    Lc = pl.cdiv(Lraw, 128) * 128            # lane-padded flat canvas length

    # Batch packing: GB images per grid step fill the 8 sublanes (C=4 -> GB=2).
    GB = max(1, 8 // C) if C <= 8 else 1
    if N % GB != 0:
        GB = 1
    NG = N // GB                             # grid steps (batch groups)
    NC = C * GB                              # packed sublane rows per step

    # --- static invariants (review: make canvas / roll-wrap safety explicit) --
    assert PC >= max(P1, P2)
    assert PC >= (K // 2) * max(D1, D2), "tap would leave its canvas row"
    max_off = (K // 2) * max(D1, D2) * (Wc + 1)      # largest |flattened tap|
    lo = PC * Wc + PC                                # first kept interior lane
    hi = (PC + H - 1) * Wc + (PC + W - 1)            # last kept interior lane
    assert lo - max_off >= 0 and hi + max_off <= Lraw - 1, (
        "pltpu.roll wrap-around would contaminate lanes the wrapper keeps")
    # Whole-image blocks are fine at these sizes; real resolutions need
    # row-strip tiling with a D2-dilation halo before this assert fires.
    # TODO(synk): row-strip tiling for large H*W*C (v7x has only 64 MiB VMEM).
    block_bytes = 4 * (NC * Lc * 2 + NC * K * K * C * 2 + NC * 2 + Lc)
    assert 8 * block_bytes < VMEM_LIMIT

    # Canvas: spatial zero-pad by PC, flatten HxW onto the lane axis, pad to
    # Lc, then pack GB batch images per group, channel-major / image-minor.
    x_c = jnp.pad(x_nchw.astype(jnp.float32),
                  ((0, 0), (0, 0), (PC, PC), (PC, PC))).reshape(N, C, Lraw)
    x_c = jnp.pad(x_c, ((0, 0), (0, 0), (0, Lc - Lraw)))
    x_packed = (x_c.reshape(NG, GB, C, Lc)
                   .transpose(0, 2, 1, 3)
                   .reshape(NG, NC, Lc))

    w1cols = _pack_weight_cols(w1, C, GB)            # (NC, K*K*C)
    w2cols = _pack_weight_cols(w2, C, GB)
    b1col = jnp.repeat(b1.astype(jnp.float32), GB)[:, None]   # (NC, 1)
    b2col = jnp.repeat(b2.astype(jnp.float32), GB)[:, None]

    # Interior mask over the flat canvas (1 inside the HxW image, else 0).
    mask2d = np.zeros((Hc, Wc), np.float32)
    mask2d[PC:PC + H, PC:PC + W] = 1.0
    mask_np = np.zeros((1, Lc), np.float32)
    mask_np[0, :Lraw] = mask2d.reshape(-1)
    mask = jnp.asarray(mask_np)

    out_packed = pl.pallas_call(
        make_dblock_kernel(NC, C, GB, Wc, Lc),
        out_shape=jax.ShapeDtypeStruct((NG, NC, Lc), x_nchw.dtype),
        grid_spec=pltpu.PrefetchScalarGridSpec(
            num_scalar_prefetch=0,
            grid=(NG,),                              # batch groups -> v7x TCs
            in_specs=[
                pl.BlockSpec((1, NC, Lc), lambda g: (g, 0, 0)),
                pl.BlockSpec((NC, K * K * C), lambda g: (0, 0)),
                pl.BlockSpec((NC, 1), lambda g: (0, 0)),
                pl.BlockSpec((NC, K * K * C), lambda g: (0, 0)),
                pl.BlockSpec((NC, 1), lambda g: (0, 0)),
                pl.BlockSpec((1, Lc), lambda g: (0, 0)),
            ],
            out_specs=pl.BlockSpec((1, NC, Lc), lambda g: (g, 0, 0)),
        ),
        compiler_params=pltpu.CompilerParams(
            dimension_semantics=("parallel",),
            vmem_limit_bytes=VMEM_LIMIT,
        ),
    )(x_packed, w1cols, b1col, w2cols, b2col, mask)

    # Unpack groups, drop the lane tail and the canvas border (tiny XLA slice).
    out = (out_packed.reshape(NG, C, GB, Lc)
                     .transpose(0, 2, 1, 3)
                     .reshape(N, C, Lc)[:, :, :Lraw]
                     .reshape(N, C, Hc, Wc)[:, :, PC:PC + H, PC:PC + W])
    return out


dblock_com_forward = jax.jit(_dblock_com_forward_impl)


def _leaky(x):
    # LeakyReLU with negative_slope == 1.0 (identity); kept for spec fidelity.
    return jnp.where(x >= 0, x, NEG_SLOPE * x)


def reference_forward(x_nchw, w1, b1, w2, b2):
    """Plain-JAX reference (lax dilated conv), for a numeric cross-check."""
    dn = ("NCHW", "OIHW", "NCHW")
    y = lax.conv_general_dilated(
        x_nchw, w1, (1, 1), [(P1, P1), (P1, P1)],
        rhs_dilation=(D1, D1), dimension_numbers=dn,
        precision=lax.Precision.HIGHEST) + b1[None, :, None, None]
    y = _leaky(y)
    y = lax.conv_general_dilated(
        y, w2, (1, 1), [(P2, P2), (P2, P2)],
        rhs_dilation=(D2, D2), dimension_numbers=dn,
        precision=lax.Precision.HIGHEST) + b2[None, :, None, None]
    return _leaky(y)


if __name__ == "__main__":
    N, C, H, W = 2, 4, 16, 16    # in_channels == out_channels (the Sequential requires it)
    key = jax.random.PRNGKey(0)
    kx, kw1, kb1, kw2, kb2 = jax.random.split(key, 5)

    x = jax.random.normal(kx, (N, C, H, W), jnp.float32)
    w1 = 0.1 * jax.random.normal(kw1, (C, C, K, K), jnp.float32)   # conv(dilation=2)
    b1 = 0.1 * jax.random.normal(kb1, (C,), jnp.float32)
    w2 = 0.1 * jax.random.normal(kw2, (C, C, K, K), jnp.float32)   # conv(dilation=3)
    b2 = 0.1 * jax.random.normal(kb2, (C,), jnp.float32)

    out = jax.block_until_ready(dblock_com_forward(x, w1, b1, w2, b2))

    ref = reference_forward(x, w1, b1, w2, b2)
    np.testing.assert_allclose(np.asarray(out), np.asarray(ref),
                               rtol=1e-4, atol=1e-4)
    print("KERNEL_OK")
</pallas_src>

<mosaic_0001>
module attributes {stable_mosaic.version = 11 : i64} {
  func.func @kernel(%arg0: i32, %arg1: memref<1x8x512xf32, #tpu.memory_space<vmem>>, %arg2: memref<8x36xf32, #tpu.memory_space<vmem>>, %arg3: memref<8x1xf32, #tpu.memory_space<vmem>>, %arg4: memref<8x36xf32, #tpu.memory_space<vmem>>, %arg5: memref<8x1xf32, #tpu.memory_space<vmem>>, %arg6: memref<1x512xf32, #tpu.memory_space<vmem>>, %arg7: memref<1x8x512xf32, #tpu.memory_space<vmem>>) attributes {dimension_semantics = [#tpu.dimension_semantics<parallel>], iteration_bounds = array<i64: 1>, scalar_prefetch = 0 : i64, scratch_operands = 0 : i64, tpu.core_type = #tpu.core_type<tc>, window_params = [{transform_indices = @transform_0, window_bounds = array<i64: 1, 8, 512>}, {pipeline_mode = #tpu.pipeline_mode<synchronous>, transform_indices = @transform_1, window_bounds = array<i64: 8, 36>}, {pipeline_mode = #tpu.pipeline_mode<synchronous>, transform_indices = @transform_2, window_bounds = array<i64: 8, 1>}, {pipeline_mode = #tpu.pipeline_mode<synchronous>, transform_indices = @transform_3, window_bounds = array<i64: 8, 36>}, {pipeline_mode = #tpu.pipeline_mode<synchronous>, transform_indices = @transform_4, window_bounds = array<i64: 8, 1>}, {pipeline_mode = #tpu.pipeline_mode<synchronous>, transform_indices = @transform_5, window_bounds = array<i64: 1, 512>}, {transform_indices = @transform_6, window_bounds = array<i64: 1, 8, 512>}]} {
    %c0 = arith.constant 0 : index
    %c0_0 = arith.constant 0 : index
    %c0_1 = arith.constant 0 : index
    %0 = vector.load %arg1[%c0, %c0_0, %c0_1] : memref<1x8x512xf32, #tpu.memory_space<vmem>>, vector<1x8x512xf32>
    %1 = vector.shape_cast %0 : vector<1x8x512xf32> to vector<8x512xf32>
    %c0_2 = arith.constant 0 : index
    %c0_3 = arith.constant 0 : index
    %2 = vector.load %arg2[%c0_2, %c0_3] : memref<8x36xf32, #tpu.memory_space<vmem>>, vector<8x36xf32>
    %c0_4 = arith.constant 0 : index
    %c0_5 = arith.constant 0 : index
    %3 = vector.load %arg4[%c0_4, %c0_5] : memref<8x36xf32, #tpu.memory_space<vmem>>, vector<8x36xf32>
    %c0_6 = arith.constant 0 : index
    %c0_7 = arith.constant 0 : index
    %4 = vector.load %arg6[%c0_6, %c0_7] : memref<1x512xf32, #tpu.memory_space<vmem>>, vector<1x512xf32>
    %cst = arith.constant 0.000000e+00 : f32
    %5 = vector.broadcast %cst : f32 to vector<8x512xf32>
    %cst_8 = arith.constant 0.000000e+00 : f32
    %6 = vector.broadcast %cst_8 : f32 to vector<8x512xf32>
    %cst_9 = arith.constant 0.000000e+00 : f32
    %7 = vector.broadcast %cst_9 : f32 to vector<8x512xf32>
    %cst_10 = arith.constant 0.000000e+00 : f32
    %8 = vector.broadcast %cst_10 : f32 to vector<8x512xf32>
    %c46_i32 = arith.constant 46 : i32
    %9 = tpu.dynamic_rotate %1 by %c46_i32 dim 1 : vector<8x512xf32>, i32 -> vector<8x512xf32>
    %10 = vector.extract_strided_slice %2 {offsets = [0, 0], sizes = [8, 1], strides = [1, 1]} : vector<8x36xf32> to vector<8x1xf32>
    %11 = vector.broadcast %10 : vector<8x1xf32> to vector<8x512xf32>
    %12 = arith.mulf %9, %11 : vector<8x512xf32>
    %13 = arith.addf %5, %12 : vector<8x512xf32>
    %c6_i32 = arith.constant 6 : i32
    %14 = tpu.dynamic_rotate %9 by %c6_i32 dim 0 : vector<8x512xf32>, i32 -> vector<8x512xf32>
    %15 = vector.extract_strided_slice %2 {offsets = [0, 1], sizes = [8, 1], strides = [1, 1]} : vector<8x36xf32> to vector<8x1xf32>
    %16 = vector.broadcast %15 : vector<8x1xf32> to vector<8x512xf32>
    %17 = arith.mulf %14, %16 : vector<8x512xf32>
    %18 = arith.addf %6, %17 : vector<8x512xf32>
    %c4_i32 = arith.constant 4 : i32
    %19 = tpu.dynamic_rotate %9 by %c4_i32 dim 0 : vector<8x512xf32>, i32 -> vector<8x512xf32>
    %20 = vector.extract_strided_slice %2 {offsets = [0, 2], sizes = [8, 1], strides = [1, 1]} : vector<8x36xf32> to vector<8x1xf32>
    %21 = vector.broadcast %20 : vector<8x1xf32> to vector<8x512xf32>
    %22 = arith.mulf %19, %21 : vector<8x512xf32>
    %23 = arith.addf %7, %22 : vector<8x512xf32>
    %c2_i32 = arith.constant 2 : i32
    %24 = tpu.dynamic_rotate %9 by %c2_i32 dim 0 : vector<8x512xf32>, i32 -> vector<8x512xf32>
    %25 = vector.extract_strided_slice %2 {offsets = [0, 3], sizes = [8, 1], strides = [1, 1]} : vector<8x36xf32> to vector<8x1xf32>
    %26 = vector.broadcast %25 : vector<8x1xf32> to vector<8x512xf32>
    %27 = arith.mulf %24, %26 : vector<8x512xf32>
    %28 = arith.addf %8, %27 : vector<8x512xf32>
    %c44_i32 = arith.constant 44 : i32
    %29 = tpu.dynamic_rotate %1 by %c44_i32 dim 1 : vector<8x512xf32>, i32 -> vector<8x512xf32>
    %30 = vector.extract_strided_slice %2 {offsets = [0, 4], sizes = [8, 1], strides = [1, 1]} : vector<8x36xf32> to vector<8x1xf32>
    %31 = vector.broadcast %30 : vector<8x1xf32> to vector<8x512xf32>
    %32 = arith.mulf %29, %31 : vector<8x512xf32>
    %33 = arith.addf %13, %32 : vector<8x512xf32>
    %c6_i32_11 = arith.constant 6 : i32
    %34 = tpu.dynamic_rotate %29 by %c6_i32_11 dim 0 : vector<8x512xf32>, i32 -> vector<8x512xf32>
    %35 = vector.extract_strided_slice %2 {offsets = [0, 5], sizes = [8, 1], strides = [1, 1]} : vector<8x36xf32> to vector<8x1xf32>
    %36 = vector.broadcast %35 : vector<8x1xf32> to vector<8x512xf32>
    %37 = arith.mulf %34, %36 : vector<8x512xf32>
    %38 = arith.addf %18, %37 : vector<8x512xf32>
    %c4_i32_12 = arith.constant 4 : i32
    %39 = tpu.dynamic_rotate %29 by %c4_i32_12 dim 0 : vector<8x512xf32>, i32 -> vector<8x512xf32>
    %40 = vector.extract_strided_slice %2 {offsets = [0, 6], sizes = [8, 1], strides = [1, 1]} : vector<8x36xf32> to vector<8x1xf32>
    %41 = vector.broadcast %40 : vector<8x1xf32> to vector<8x512xf32>
    %42 = arith.mulf %39, %41 : vector<8x512xf32>
    %43 = arith.addf %23, %42 : vector<8x512xf32>
    %c2_i32_13 = arith.constant 2 : i32
    %44 = tpu.dynamic_rotate %29 by %c2_i32_13 dim 0 : vector<8x512xf32>, i32 -> vector<8x512xf32>
    %45 = vector.extract_strided_slice %2 {offsets = [0, 7], sizes = [8, 1], strides = [1, 1]} : vector<8x36xf32> to vector<8x1xf32>
    %46 = vector.broadcast %45 : vector<8x1xf32> to vector<8x512xf32>
    %47 = arith.mulf %44, %46 : vector<8x512xf32>
    %48 = arith.addf %28, %47 : vector<8x512xf32>
    %c42_i32 = arith.constant 42 : i32
    %49 = tpu.dynamic_rotate %1 by %c42_i32 dim 1 : vector<8x512xf32>, i32 -> vector<8x512xf32>
    %50 = vector.extract_strided_slice %2 {offsets = [0, 8], sizes = [8, 1], strides = [1, 1]} : vector<8x36xf32> to vector<8x1xf32>
    %51 = vector.broadcast %50 : vector<8x1xf32> to vector<8x512xf32>
    %52 = arith.mulf %49, %51 : vector<8x512xf32>
    %53 = arith.addf %33, %52 : vector<8x512xf32>
    %c6_i32_14 = arith.constant 6 : i32
    %54 = tpu.dynamic_rotate %49 by %c6_i32_14 dim 0 : vector<8x512xf32>, i32 -> vector<8x512xf32>
    %55 = vector.extract_strided_slice %2 {offsets = [0, 9], sizes = [8, 1], strides = [1, 1]} : vector<8x36xf32> to vector<8x1xf32>
    %56 = vector.broadcast %55 : vector<8x1xf32> to vector<8x512xf32>
    %57 = arith.mulf %54, %56 : vector<8x512xf32>
    %58 = arith.addf %38, %57 : vector<8x512xf32>
    %c4_i32_15 = arith.constant 4 : i32
    %59 = tpu.dynamic_rotate %49 by %c4_i32_15 dim 0 : vector<8x512xf32>, i32 -> vector<8x512xf32>
    %60 = vector.extract_strided_slice %2 {offsets = [0, 10], sizes = [8, 1], strides = [1, 1]} : vector<8x36xf32> to vector<8x1xf32>
    %61 = vector.broadcast %60 : vector<8x1xf32> to vector<8x512xf32>
    %62 = arith.mulf %59, %61 : vector<8x512xf32>
    %63 = arith.addf %43, %62 : vector<8x512xf32>
    %c2_i32_16 = arith.constant 2 : i32
    %64 = tpu.dynamic_rotate %49 by %c2_i32_16 dim 0 : vector<8x512xf32>, i32 -> vector<8x512xf32>
    %65 = vector.extract_strided_slice %2 {offsets = [0, 11], sizes = [8, 1], strides = [1, 1]} : vector<8x36xf32> to vector<8x1xf32>
    %66 = vector.broadcast %65 : vector<8x1xf32> to vector<8x512xf32>
    %67 = arith.mulf %64, %66 : vector<8x512xf32>
    %68 = arith.addf %48, %67 : vector<8x512xf32>
    %c2_i32_17 = arith.constant 2 : i32
    %69 = tpu.dynamic_rotate %1 by %c2_i32_17 dim 1 : vector<8x512xf32>, i32 -> vector<8x512xf32>
    %70 = vector.extract_strided_slice %2 {offsets = [0, 12], sizes = [8, 1], strides = [1, 1]} : vector<8x36xf32> to vector<8x1xf32>
    %71 = vector.broadcast %70 : vector<8x1xf32> to vector<8x512xf32>
    %72 = arith.mulf %69, %71 : vector<8x512xf32>
    %73 = arith.addf %53, %72 : vector<8x512xf32>
    %c6_i32_18 = arith.constant 6 : i32
    %74 = tpu.dynamic_rotate %69 by %c6_i32_18 dim 0 : vector<8x512xf32>, i32 -> vector<8x512xf32>
    %75 = vector.extract_strided_slice %2 {offsets = [0, 13], sizes = [8, 1], strides = [1, 1]} : vector<8x36xf32> to vector<8x1xf32>
    %76 = vector.broadcast %75 : vector<8x1xf32> to vector<8x512xf32>
    %77 = arith.mulf %74, %76 : vector<8x512xf32>
    %78 = arith.addf %58, %77 : vector<8x512xf32>
    %c4_i32_19 = arith.constant 4 : i32
    %79 = tpu.dynamic_rotate %69 by %c4_i32_19 dim 0 : vector<8x512xf32>, i32 -> vector<8x512xf32>
    %80 = vector.extract_strided_slice %2 {offsets = [0, 14], sizes = [8, 1], strides = [1, 1]} : vector<8x36xf32> to vector<8x1xf32>
    %81 = vector.broadcast %80 : vector<8x1xf32> to vector<8x512xf32>
    %82 = arith.mulf %79, %81 : vector<8x512xf32>
    %83 = arith.addf %63, %82 : vector<8x512xf32>
    %c2_i32_20 = arith.constant 2 : i32
    %84 = tpu.dynamic_rotate %69 by %c2_i32_20 dim 0 : vector<8x512xf32>, i32 -> vector<8x512xf32>
    %85 = vector.extract_strided_slice %2 {offsets = [0, 15], sizes = [8, 1], strides = [1, 1]} : vector<8x36xf32> to vector<8x1xf32>
    %86 = vector.broadcast %85 : vector<8x1xf32> to vector<8x512xf32>
    %87 = arith.mulf %84, %86 : vector<8x512xf32>
    %88 = arith.addf %68, %87 : vector<8x512xf32>
    %89 = vector.extract_strided_slice %2 {offsets = [0, 16], sizes = [8, 1], strides = [1, 1]} : vector<8x36xf32> to vector<8x1xf32>
    %90 = vector.broadcast %89 : vector<8x1xf32> to vector<8x512xf32>
    %91 = arith.mulf %1, %90 : vector<8x512xf32>
    %92 = arith.addf %73, %91 : vector<8x512xf32>
    %c6_i32_21 = arith.constant 6 : i32
    %93 = tpu.dynamic_rotate %1 by %c6_i32_21 dim 0 : vector<8x512xf32>, i32 -> vector<8x512xf32>
    %94 = vector.extract_strided_slice %2 {offsets = [0, 17], sizes = [8, 1], strides = [1, 1]} : vector<8x36xf32> to vector<8x1xf32>
    %95 = vector.broadcast %94 : vector<8x1xf32> to vector<8x512xf32>
    %96 = arith.mulf %93, %95 : vector<8x512xf32>
    %97 = arith.addf %78, %96 : vector<8x512xf32>
    %c4_i32_22 = arith.constant 4 : i32
    %98 = tpu.dynamic_rotate %1 by %c4_i32_22 dim 0 : vector<8x512xf32>, i32 -> vector<8x512xf32>
    %99 = vector.extract_strided_slice %2 {offsets = [0, 18], sizes = [8, 1], strides = [1, 1]} : vector<8x36xf32> to vector<8x1xf32>
    %100 = vector.broadcast %99 : vector<8x1xf32> to vector<8x512xf32>
    %101 = arith.mulf %98, %100 : vector<8x512xf32>
    %102 = arith.addf %83, %101 : vector<8x512xf32>
    %c2_i32_23 = arith.constant 2 : i32
    %103 = tpu.dynamic_rotate %1 by %c2_i32_23 dim 0 : vector<8x512xf32>, i32 -> vector<8x512xf32>
    %104 = vector.extract_strided_slice %2 {offsets = [0, 19], sizes = [8, 1], strides = [1, 1]} : vector<8x36xf32> to vector<8x1xf32>
    %105 = vector.broadcast %104 : vector<8x1xf32> to vector<8x512xf32>
    %106 = arith.mulf %103, %105 : vector<8x512xf32>
    %107 = arith.addf %88, %106 : vector<8x512xf32>
    %c510_i32 = arith.constant 510 : i32
    %108 = tpu.dynamic_rotate %1 by %c510_i32 dim 1 : vector<8x512xf32>, i32 -> vector<8x512xf32>
    %109 = vector.extract_strided_slice %2 {offsets = [0, 20], sizes = [8, 1], strides = [1, 1]} : vector<8x36xf32> to vector<8x1xf32>
    %110 = vector.broadcast %109 : vector<8x1xf32> to vector<8x512xf32>
    %111 = arith.mulf %108, %110 : vector<8x512xf32>
    %112 = arith.addf %92, %111 : vector<8x512xf32>
    %c6_i32_24 = arith.constant 6 : i32
    %113 = tpu.dynamic_rotate %108 by %c6_i32_24 dim 0 : vector<8x512xf32>, i32 -> vector<8x512xf32>
    %114 = vector.extract_strided_slice %2 {offsets = [0, 21], sizes = [8, 1], strides = [1, 1]} : vector<8x36xf32> to vector<8x1xf32>
    %115 = vector.broadcast %114 : vector<8x1xf32> to vector<8x512xf32>
    %116 = arith.mulf %113, %115 : vector<8x512xf32>
    %117 = arith.addf %97, %116 : vector<8x512xf32>
    %c4_i32_25 = arith.constant 4 : i32
    %118 = tpu.dynamic_rotate %108 by %c4_i32_25 dim 0 : vector<8x512xf32>, i32 -> vector<8x512xf32>
    %119 = vector.extract_strided_slice %2 {offsets = [0, 22], sizes = [8, 1], strides = [1, 1]} : vector<8x36xf32> to vector<8x1xf32>
    %120 = vector.broadcast %119 : vector<8x1xf32> to vector<8x512xf32>
    %121 = arith.mulf %118, %120 : vector<8x512xf32>
    %122 = arith.addf %102, %121 : vector<8x512xf32>
    %c2_i32_26 = arith.constant 2 : i32
    %123 = tpu.dynamic_rotate %108 by %c2_i32_26 dim 0 : vector<8x512xf32>, i32 -> vector<8x512xf32>
    %124 = vector.extract_strided_slice %2 {offsets = [0, 23], sizes = [8, 1], strides = [1, 1]} : vector<8x36xf32> to vector<8x1xf32>
    %125 = vector.broadcast %124 : vector<8x1xf32> to vector<8x512xf32>
    %126 = arith.mulf %123, %125 : vector<8x512xf32>
    %127 = arith.addf %107, %126 : vector<8x512xf32>
    %c470_i32 = arith.constant 470 : i32
    %128 = tpu.dynamic_rotate %1 by %c470_i32 dim 1 : vector<8x512xf32>, i32 -> vector<8x512xf32>
    %129 = vector.extract_strided_slice %2 {offsets = [0, 24], sizes = [8, 1], strides = [1, 1]} : vector<8x36xf32> to vector<8x1xf32>
    %130 = vector.broadcast %129 : vector<8x1xf32> to vector<8x512xf32>
    %131 = arith.mulf %128, %130 : vector<8x512xf32>
    %132 = arith.addf %112, %131 : vector<8x512xf32>
    %c6_i32_27 = arith.constant 6 : i32
    %133 = tpu.dynamic_rotate %128 by %c6_i32_27 dim 0 : vector<8x512xf32>, i32 -> vector<8x512xf32>
    %134 = vector.extract_strided_slice %2 {offsets = [0, 25], sizes = [8, 1], strides = [1, 1]} : vector<8x36xf32> to vector<8x1xf32>
    %135 = vector.broadcast %134 : vector<8x1xf32> to vector<8x512xf32>
    %136 = arith.mulf %133, %135 : vector<8x512xf32>
    %137 = arith.addf %117, %136 : vector<8x512xf32>
    %c4_i32_28 = arith.constant 4 : i32
    %138 = tpu.dynamic_rotate %128 by %c4_i32_28 dim 0 : vector<8x512xf32>, i32 -> vector<8x512xf32>
    %139 = vector.extract_strided_slice %2 {offsets = [0, 26], sizes = [8, 1], strides = [1, 1]} : vector<8x36xf32> to vector<8x1xf32>
    %140 = vector.broadcast %139 : vector<8x1xf32> to vector<8x512xf32>
    %141 = arith.mulf %138, %140 : vector<8x512xf32>
    %142 = arith.addf %122, %141 : vector<8x512xf32>
    %c2_i32_29 = arith.constant 2 : i32
    %143 = tpu.dynamic_rotate %128 by %c2_i32_29 dim 0 : vector<8x512xf32>, i32 -> vector<8x512xf32>
    %144 = vector.extract_strided_slice %2 {offsets = [0, 27], sizes = [8, 1], strides = [1, 1]} : vector<8x36xf32> to vector<8x1xf32>
    %145 = vector.broadcast %144 : vector<8x1xf32> to vector<8x512xf32>
    %146 = arith.mulf %143, %145 : vector<8x512xf32>
    %147 = arith.addf %127, %146 : vector<8x512xf32>
    %c468_i32 = arith.constant 468 : i32
    %148 = tpu.dynamic_rotate %1 by %c468_i32 dim 1 : vector<8x512xf32>, i32 -> vector<8x512xf32>
    %149 = vector.extract_strided_slice %2 {offsets = [0, 28], sizes = [8, 1], strides = [1, 1]} : vector<8x36xf32> to vector<8x1xf32>
    %150 = vector.broadcast %149 : vector<8x1xf32> to vector<8x512xf32>
    %151 = arith.mulf %148, %150 : vector<8x512xf32>
    %152 = arith.addf %132, %151 : vector<8x512xf32>
    %c6_i32_30 = arith.constant 6 : i32
    %153 = tpu.dynamic_rotate %148 by %c6_i32_30 dim 0 : vector<8x512xf32>, i32 -> vector<8x512xf32>
    %154 = vector.extract_strided_slice %2 {offsets = [0, 29], sizes = [8, 1], strides = [1, 1]} : vector<8x36xf32> to vector<8x1xf32>
    %155 = vector.broadcast %154 : vector<8x1xf32> to vector<8x512xf32>
    %156 = arith.mulf %153, %155 : vector<8x512xf32>
    %157 = arith.addf %137, %156 : vector<8x512xf32>
    %c4_i32_31 = arith.constant 4 : i32
    %158 = tpu.dynamic_rotate %148 by %c4_i32_31 dim 0 : vector<8x512xf32>, i32 -> vector<8x512xf32>
    %159 = vector.extract_strided_slice %2 {offsets = [0, 30], sizes = [8, 1], strides = [1, 1]} : vector<8x36xf32> to vector<8x1xf32>
    %160 = vector.broadcast %159 : vector<8x1xf32> to vector<8x512xf32>
    %161 = arith.mulf %158, %160 : vector<8x512xf32>
    %162 = arith.addf %142, %161 : vector<8x512xf32>
    %c2_i32_32 = arith.constant 2 : i32
    %163 = tpu.dynamic_rotate %148 by %c2_i32_32 dim 0 : vector<8x512xf32>, i32 -> vector<8x512xf32>
    %164 = vector.extract_strided_slice %2 {offsets = [0, 31], sizes = [8, 1], strides = [1, 1]} : vector<8x36xf32> to vector<8x1xf32>
    %165 = vector.broadcast %164 : vector<8x1xf32> to vector<8x512xf32>
    %166 = arith.mulf %163, %165 : vector<8x512xf32>
    %167 = arith.addf %147, %166 : vector<8x512xf32>
    %c466_i32 = arith.constant 466 : i32
    %168 = tpu.dynamic_rotate %1 by %c466_i32 dim 1 : vector<8x512xf32>, i32 -> vector<8x512xf32>
    %169 = vector.extract_strided_slice %2 {offsets = [0, 32], sizes = [8, 1], strides = [1, 1]} : vector<8x36xf32> to vector<8x1xf32>
    %170 = vector.broadcast %169 : vector<8x1xf32> to vector<8x512xf32>
    %171 = arith.mulf %168, %170 : vector<8x512xf32>
    %172 = arith.addf %152, %171 : vector<8x512xf32>
    %c6_i32_33 = arith.constant 6 : i32
    %173 = tpu.dynamic_rotate %168 by %c6_i32_33 dim 0 : vector<8x512xf32>, i32 -> vector<8x512xf32>
    %174 = vector.extract_strided_slice %2 {offsets = [0, 33], sizes = [8, 1], strides = [1, 1]} : vector<8x36xf32> to vector<8x1xf32>
    %175 = vector.broadcast %174 : vector<8x1xf32> to vector<8x512xf32>
    %176 = arith.mulf %173, %175 : vector<8x512xf32>
    %177 = arith.addf %157, %176 : vector<8x512xf32>
    %c4_i32_34 = arith.constant 4 : i32
    %178 = tpu.dynamic_rotate %168 by %c4_i32_34 dim 0 : vector<8x512xf32>, i32 -> vector<8x512xf32>
    %179 = vector.extract_strided_slice %2 {offsets = [0, 34], sizes = [8, 1], strides = [1, 1]} : vector<8x36xf32> to vector<8x1xf32>
    %180 = vector.broadcast %179 : vector<8x1xf32> to vector<8x512xf32>
    %181 = arith.mulf %178, %180 : vector<8x512xf32>
    %182 = arith.addf %162, %181 : vector<8x512xf32>
    %c2_i32_35 = arith.constant 2 : i32
    %183 = tpu.dynamic_rotate %168 by %c2_i32_35 dim 0 : vector<8x512xf32>, i32 -> vector<8x512xf32>
    %184 = vector.extract_strided_slice %2 {offsets = [0, 35], sizes = [8, 1], strides = [1, 1]} : vector<8x36xf32> to vector<8x1xf32>
    %185 = vector.broadcast %184 : vector<8x1xf32> to vector<8x512xf32>
    %186 = arith.mulf %183, %185 : vector<8x512xf32>
    %187 = arith.addf %167, %186 : vector<8x512xf32>
    %188 = arith.addf %172, %177 : vector<8x512xf32>
    %189 = arith.addf %182, %187 : vector<8x512xf32>
    %190 = arith.addf %188, %189 : vector<8x512xf32>
    %c0_36 = arith.constant 0 : index
    %c0_37 = arith.constant 0 : index
    %191 = vector.load %arg3[%c0_36, %c0_37] : memref<8x1xf32, #tpu.memory_space<vmem>>, vector<8x1xf32>
    %192 = vector.broadcast %191 : vector<8x1xf32> to vector<8x512xf32>
    %193 = arith.addf %190, %192 : vector<8x512xf32>
    %194 = vector.broadcast %4 : vector<1x512xf32> to vector<8x512xf32>
    %195 = arith.mulf %193, %194 : vector<8x512xf32>
    %cst_38 = arith.constant 0.000000e+00 : f32
    %196 = vector.broadcast %cst_38 : f32 to vector<8x512xf32>
    %cst_39 = arith.constant 0.000000e+00 : f32
    %197 = vector.broadcast %cst_39 : f32 to vector<8x512xf32>
    %cst_40 = arith.constant 0.000000e+00 : f32
    %198 = vector.broadcast %cst_40 : f32 to vector<8x512xf32>
    %cst_41 = arith.constant 0.000000e+00 : f32
    %199 = vector.broadcast %cst_41 : f32 to vector<8x512xf32>
    %c69_i32 = arith.constant 69 : i32
    %200 = tpu.dynamic_rotate %195 by %c69_i32 dim 1 : vector<8x512xf32>, i32 -> vector<8x512xf32>
    %201 = vector.extract_strided_slice %3 {offsets = [0, 0], sizes = [8, 1], strides = [1, 1]} : vector<8x36xf32> to vector<8x1xf32>
    %202 = vector.broadcast %201 : vector<8x1xf32> to vector<8x512xf32>
    %203 = arith.mulf %200, %202 : vector<8x512xf32>
    %204 = arith.addf %196, %203 : vector<8x512xf32>
    %c6_i32_42 = arith.constant 6 : i32
    %205 = tpu.dynamic_rotate %200 by %c6_i32_42 dim 0 : vector<8x512xf32>, i32 -> vector<8x512xf32>
    %206 = vector.extract_strided_slice %3 {offsets = [0, 1], sizes = [8, 1], strides = [1, 1]} : vector<8x36xf32> to vector<8x1xf32>
    %207 = vector.broadcast %206 : vector<8x1xf32> to vector<8x512xf32>
    %208 = arith.mulf %205, %207 : vector<8x512xf32>
    %209 = arith.addf %197, %208 : vector<8x512xf32>
    %c4_i32_43 = arith.constant 4 : i32
    %210 = tpu.dynamic_rotate %200 by %c4_i32_43 dim 0 : vector<8x512xf32>, i32 -> vector<8x512xf32>
    %211 = vector.extract_strided_slice %3 {offsets = [0, 2], sizes = [8, 1], strides = [1, 1]} : vector<8x36xf32> to vector<8x1xf32>
    %212 = vector.broadcast %211 : vector<8x1xf32> to vector<8x512xf32>
    %213 = arith.mulf %210, %212 : vector<8x512xf32>
    %214 = arith.addf %198, %213 : vector<8x512xf32>
    %c2_i32_44 = arith.constant 2 : i32
    %215 = tpu.dynamic_rotate %200 by %c2_i32_44 dim 0 : vector<8x512xf32>, i32 -> vector<8x512xf32>
    %216 = vector.extract_strided_slice %3 {offsets = [0, 3], sizes = [8, 1], strides = [1, 1]} : vector<8x36xf32> to vector<8x1xf32>
    %217 = vector.broadcast %216 : vector<8x1xf32> to vector<8x512xf32>
    %218 = arith.mulf %215, %217 : vector<8x512xf32>
    %219 = arith.addf %199, %218 : vector<8x512xf32>
    %c66_i32 = arith.constant 66 : i32
    %220 = tpu.dynamic_rotate %195 by %c66_i32 dim 1 : vector<8x512xf32>, i32 -> vector<8x512xf32>
    %221 = vector.extract_strided_slice %3 {offsets = [0, 4], sizes = [8, 1], strides = [1, 1]} : vector<8x36xf32> to vector<8x1xf32>
    %222 = vector.broadcast %221 : vector<8x1xf32> to vector<8x512xf32>
    %223 = arith.mulf %220, %222 : vector<8x512xf32>
    %224 = arith.addf %204, %223 : vector<8x512xf32>
    %c6_i32_45 = arith.constant 6 : i32
    %225 = tpu.dynamic_rotate %220 by %c6_i32_45 dim 0 : vector<8x512xf32>, i32 -> vector<8x512xf32>
    %226 = vector.extract_strided_slice %3 {offsets = [0, 5], sizes = [8, 1], strides = [1, 1]} : vector<8x36xf32> to vector<8x1xf32>
    %227 = vector.broadcast %226 : vector<8x1xf32> to vector<8x512xf32>
    %228 = arith.mulf %225, %227 : vector<8x512xf32>
    %229 = arith.addf %209, %228 : vector<8x512xf32>
    %c4_i32_46 = arith.constant 4 : i32
    %230 = tpu.dynamic_rotate %220 by %c4_i32_46 dim 0 : vector<8x512xf32>, i32 -> vector<8x512xf32>
    %231 = vector.extract_strided_slice %3 {offsets = [0, 6], sizes = [8, 1], strides = [1, 1]} : vector<8x36xf32> to vector<8x1xf32>
    %232 = vector.broadcast %231 : vector<8x1xf32> to vector<8x512xf32>
    %233 = arith.mulf %230, %232 : vector<8x512xf32>
    %234 = arith.addf %214, %233 : vector<8x512xf32>
    %c2_i32_47 = arith.constant 2 : i32
    %235 = tpu.dynamic_rotate %220 by %c2_i32_47 dim 0 : vector<8x512xf32>, i32 -> vector<8x512xf32>
    %236 = vector.extract_strided_slice %3 {offsets = [0, 7], sizes = [8, 1], strides = [1, 1]} : vector<8x36xf32> to vector<8x1xf32>
    %237 = vector.broadcast %236 : vector<8x1xf32> to vector<8x512xf32>
    %238 = arith.mulf %235, %237 : vector<8x512xf32>
    %239 = arith.addf %219, %238 : vector<8x512xf32>
    %c63_i32 = arith.constant 63 : i32
    %240 = tpu.dynamic_rotate %195 by %c63_i32 dim 1 : vector<8x512xf32>, i32 -> vector<8x512xf32>
    %241 = vector.extract_strided_slice %3 {offsets = [0, 8], sizes = [8, 1], strides = [1, 1]} : vector<8x36xf32> to vector<8x1xf32>
    %242 = vector.broadcast %241 : vector<8x1xf32> to vector<8x512xf32>
    %243 = arith.mulf %240, %242 : vector<8x512xf32>
    %244 = arith.addf %224, %243 : vector<8x512xf32>
    %c6_i32_48 = arith.constant 6 : i32
    %245 = tpu.dynamic_rotate %240 by %c6_i32_48 dim 0 : vector<8x512xf32>, i32 -> vector<8x512xf32>
    %246 = vector.extract_strided_slice %3 {offsets = [0, 9], sizes = [8, 1], strides = [1, 1]} : vector<8x36xf32> to vector<8x1xf32>
    %247 = vector.broadcast %246 : vector<8x1xf32> to vector<8x512xf32>
    %248 = arith.mulf %245, %247 : vector<8x512xf32>
    %249 = arith.addf %229, %248 : vector<8x512xf32>
    %c4_i32_49 = arith.constant 4 : i32
    %250 = tpu.dynamic_rotate %240 by %c4_i32_49 dim 0 : vector<8x512xf32>, i32 -> vector<8x512xf32>
    %251 = vector.extract_strided_slice %3 {offsets = [0, 10], sizes = [8, 1], strides = [1, 1]} : vector<8x36xf32> to vector<8x1xf32>
    %252 = vector.broadcast %251 : vector<8x1xf32> to vector<8x512xf32>
    %253 = arith.mulf %250, %252 : vector<8x512xf32>
    %254 = arith.addf %234, %253 : vector<8x512xf32>
    %c2_i32_50 = arith.constant 2 : i32
    %255 = tpu.dynamic_rotate %240 by %c2_i32_50 dim 0 : vector<8x512xf32>, i32 -> vector<8x512xf32>
    %256 = vector.extract_strided_slice %3 {offsets = [0, 11], sizes = [8, 1], strides = [1, 1]} : vector<8x36xf32> to vector<8x1xf32>
    %257 = vector.broadcast %256 : vector<8x1xf32> to vector<8x512xf32>
    %258 = arith.mulf %255, %257 : vector<8x512xf32>
    %259 = arith.addf %239, %258 : vector<8x512xf32>
    %c3_i32 = arith.constant 3 : i32
    %260 = tpu.dynamic_rotate %195 by %c3_i32 dim 1 : vector<8x512xf32>, i32 -> vector<8x512xf32>
    %261 = vector.extract_strided_slice %3 {offsets = [0, 12], sizes = [8, 1], strides = [1, 1]} : vector<8x36xf32> to vector<8x1xf32>
    %262 = vector.broadcast %261 : vector<8x1xf32> to vector<8x512xf32>
    %263 = arith.mulf %260, %262 : vector<8x512xf32>
    %264 = arith.addf %244, %263 : vector<8x512xf32>
    %c6_i32_51 = arith.constant 6 : i32
    %265 = tpu.dynamic_rotate %260 by %c6_i32_51 dim 0 : vector<8x512xf32>, i32 -> vector<8x512xf32>
    %266 = vector.extract_strided_slice %3 {offsets = [0, 13], sizes = [8, 1], strides = [1, 1]} : vector<8x36xf32> to vector<8x1xf32>
    %267 = vector.broadcast %266 : vector<8x1xf32> to vector<8x512xf32>
    %268 = arith.mulf %265, %267 : vector<8x512xf32>
    %269 = arith.addf %249, %268 : vector<8x512xf32>
    %c4_i32_52 = arith.constant 4 : i32
    %270 = tpu.dynamic_rotate %260 by %c4_i32_52 dim 0 : vector<8x512xf32>, i32 -> vector<8x512xf32>
    %271 = vector.extract_strided_slice %3 {offsets = [0, 14], sizes = [8, 1], strides = [1, 1]} : vector<8x36xf32> to vector<8x1xf32>
    %272 = vector.broadcast %271 : vector<8x1xf32> to vector<8x512xf32>
    %273 = arith.mulf %270, %272 : vector<8x512xf32>
    %274 = arith.addf %254, %273 : vector<8x512xf32>
    %c2_i32_53 = arith.constant 2 : i32
    %275 = tpu.dynamic_rotate %260 by %c2_i32_53 dim 0 : vector<8x512xf32>, i32 -> vector<8x512xf32>
    %276 = vector.extract_strided_slice %3 {offsets = [0, 15], sizes = [8, 1], strides = [1, 1]} : vector<8x36xf32> to vector<8x1xf32>
    %277 = vector.broadcast %276 : vector<8x1xf32> to vector<8x512xf32>
    %278 = arith.mulf %275, %277 : vector<8x512xf32>
    %279 = arith.addf %259, %278 : vector<8x512xf32>
    %280 = vector.extract_strided_slice %3 {offsets = [0, 16], sizes = [8, 1], strides = [1, 1]} : vector<8x36xf32> to vector<8x1xf32>
    %281 = vector.broadcast %280 : vector<8x1xf32> to vector<8x512xf32>
    %282 = arith.mulf %195, %281 : vector<8x512xf32>
    %283 = arith.addf %264, %282 : vector<8x512xf32>
    %c6_i32_54 = arith.constant 6 : i32
    %284 = tpu.dynamic_rotate %195 by %c6_i32_54 dim 0 : vector<8x512xf32>, i32 -> vector<8x512xf32>
    %285 = vector.extract_strided_slice %3 {offsets = [0, 17], sizes = [8, 1], strides = [1, 1]} : vector<8x36xf32> to vector<8x1xf32>
    %286 = vector.broadcast %285 : vector<8x1xf32> to vector<8x512xf32>
    %287 = arith.mulf %284, %286 : vector<8x512xf32>
    %288 = arith.addf %269, %287 : vector<8x512xf32>
    %c4_i32_55 = arith.constant 4 : i32
    %289 = tpu.dynamic_rotate %195 by %c4_i32_55 dim 0 : vector<8x512xf32>, i32 -> vector<8x512xf32>
    %290 = vector.extract_strided_slice %3 {offsets = [0, 18], sizes = [8, 1], strides = [1, 1]} : vector<8x36xf32> to vector<8x1xf32>
    %291 = vector.broadcast %290 : vector<8x1xf32> to vector<8x512xf32>
    %292 = arith.mulf %289, %291 : vector<8x512xf32>
    %293 = arith.addf %274, %292 : vector<8x512xf32>
    %c2_i32_56 = arith.constant 2 : i32
    %294 = tpu.dynamic_rotate %195 by %c2_i32_56 dim 0 : vector<8x512xf32>, i32 -> vector<8x512xf32>
    %295 = vector.extract_strided_slice %3 {offsets = [0, 19], sizes = [8, 1], strides = [1, 1]} : vector<8x36xf32> to vector<8x1xf32>
    %296 = vector.broadcast %295 : vector<8x1xf32> to vector<8x512xf32>
    %297 = arith.mulf %294, %296 : vector<8x512xf32>
    %298 = arith.addf %279, %297 : vector<8x512xf32>
    %c509_i32 = arith.constant 509 : i32
    %299 = tpu.dynamic_rotate %195 by %c509_i32 dim 1 : vector<8x512xf32>, i32 -> vector<8x512xf32>
    %300 = vector.extract_strided_slice %3 {offsets = [0, 20], sizes = [8, 1], strides = [1, 1]} : vector<8x36xf32> to vector<8x1xf32>
    %301 = vector.broadcast %300 : vector<8x1xf32> to vector<8x512xf32>
    %302 = arith.mulf %299, %301 : vector<8x512xf32>
    %303 = arith.addf %283, %302 : vector<8x512xf32>
    %c6_i32_57 = arith.constant 6 : i32
    %304 = tpu.dynamic_rotate %299 by %c6_i32_57 dim 0 : vector<8x512xf32>, i32 -> vector<8x512xf32>
    %305 = vector.extract_strided_slice %3 {offsets = [0, 21], sizes = [8, 1], strides = [1, 1]} : vector<8x36xf32> to vector<8x1xf32>
    %306 = vector.broadcast %305 : vector<8x1xf32> to vector<8x512xf32>
    %307 = arith.mulf %304, %306 : vector<8x512xf32>
    %308 = arith.addf %288, %307 : vector<8x512xf32>
    %c4_i32_58 = arith.constant 4 : i32
    %309 = tpu.dynamic_rotate %299 by %c4_i32_58 dim 0 : vector<8x512xf32>, i32 -> vector<8x512xf32>
    %310 = vector.extract_strided_slice %3 {offsets = [0, 22], sizes = [8, 1], strides = [1, 1]} : vector<8x36xf32> to vector<8x1xf32>
    %311 = vector.broadcast %310 : vector<8x1xf32> to vector<8x512xf32>
    %312 = arith.mulf %309, %311 : vector<8x512xf32>
    %313 = arith.addf %293, %312 : vector<8x512xf32>
    %c2_i32_59 = arith.constant 2 : i32
    %314 = tpu.dynamic_rotate %299 by %c2_i32_59 dim 0 : vector<8x512xf32>, i32 -> vector<8x512xf32>
    %315 = vector.extract_strided_slice %3 {offsets = [0, 23], sizes = [8, 1], strides = [1, 1]} : vector<8x36xf32> to vector<8x1xf32>
    %316 = vector.broadcast %315 : vector<8x1xf32> to vector<8x512xf32>
    %317 = arith.mulf %314, %316 : vector<8x512xf32>
    %318 = arith.addf %298, %317 : vector<8x512xf32>
    %c449_i32 = arith.constant 449 : i32
    %319 = tpu.dynamic_rotate %195 by %c449_i32 dim 1 : vector<8x512xf32>, i32 -> vector<8x512xf32>
    %320 = vector.extract_strided_slice %3 {offsets = [0, 24], sizes = [8, 1], strides = [1, 1]} : vector<8x36xf32> to vector<8x1xf32>
    %321 = vector.broadcast %320 : vector<8x1xf32> to vector<8x512xf32>
    %322 = arith.mulf %319, %321 : vector<8x512xf32>
    %323 = arith.addf %303, %322 : vector<8x512xf32>
    %c6_i32_60 = arith.constant 6 : i32
    %324 = tpu.dynamic_rotate %319 by %c6_i32_60 dim 0 : vector<8x512xf32>, i32 -> vector<8x512xf32>
    %325 = vector.extract_strided_slice %3 {offsets = [0, 25], sizes = [8, 1], strides = [1, 1]} : vector<8x36xf32> to vector<8x1xf32>
    %326 = vector.broadcast %325 : vector<8x1xf32> to vector<8x512xf32>
    %327 = arith.mulf %324, %326 : vector<8x512xf32>
    %328 = arith.addf %308, %327 : vector<8x512xf32>
    %c4_i32_61 = arith.constant 4 : i32
    %329 = tpu.dynamic_rotate %319 by %c4_i32_61 dim 0 : vector<8x512xf32>, i32 -> vector<8x512xf32>
    %330 = vector.extract_strided_slice %3 {offsets = [0, 26], sizes = [8, 1], strides = [1, 1]} : vector<8x36xf32> to vector<8x1xf32>
    %331 = vector.broadcast %330 : vector<8x1xf32> to vector<8x512xf32>
    %332 = arith.mulf %329, %331 : vector<8x512xf32>
    %333 = arith.addf %313, %332 : vector<8x512xf32>
    %c2_i32_62 = arith.constant 2 : i32
    %334 = tpu.dynamic_rotate %319 by %c2_i32_62 dim 0 : vector<8x512xf32>, i32 -> vector<8x512xf32>
    %335 = vector.extract_strided_slice %3 {offsets = [0, 27], sizes = [8, 1], strides = [1, 1]} : vector<8x36xf32> to vector<8x1xf32>
    %336 = vector.broadcast %335 : vector<8x1xf32> to vector<8x512xf32>
    %337 = arith.mulf %334, %336 : vector<8x512xf32>
    %338 = arith.addf %318, %337 : vector<8x512xf32>
    %c446_i32 = arith.constant 446 : i32
    %339 = tpu.dynamic_rotate %195 by %c446_i32 dim 1 : vector<8x512xf32>, i32 -> vector<8x512xf32>
    %340 = vector.extract_strided_slice %3 {offsets = [0, 28], sizes = [8, 1], strides = [1, 1]} : vector<8x36xf32> to vector<8x1xf32>
    %341 = vector.broadcast %340 : vector<8x1xf32> to vector<8x512xf32>
    %342 = arith.mulf %339, %341 : vector<8x512xf32>
    %343 = arith.addf %323, %342 : vector<8x512xf32>
    %c6_i32_63 = arith.constant 6 : i32
    %344 = tpu.dynamic_rotate %339 by %c6_i32_63 dim 0 : vector<8x512xf32>, i32 -> vector<8x512xf32>
    %345 = vector.extract_strided_slice %3 {offsets = [0, 29], sizes = [8, 1], strides = [1, 1]} : vector<8x36xf32> to vector<8x1xf32>
    %346 = vector.broadcast %345 : vector<8x1xf32> to vector<8x512xf32>
    %347 = arith.mulf %344, %346 : vector<8x512xf32>
    %348 = arith.addf %328, %347 : vector<8x512xf32>
    %c4_i32_64 = arith.constant 4 : i32
    %349 = tpu.dynamic_rotate %339 by %c4_i32_64 dim 0 : vector<8x512xf32>, i32 -> vector<8x512xf32>
    %350 = vector.extract_strided_slice %3 {offsets = [0, 30], sizes = [8, 1], strides = [1, 1]} : vector<8x36xf32> to vector<8x1xf32>
    %351 = vector.broadcast %350 : vector<8x1xf32> to vector<8x512xf32>
    %352 = arith.mulf %349, %351 : vector<8x512xf32>
    %353 = arith.addf %333, %352 : vector<8x512xf32>
    %c2_i32_65 = arith.constant 2 : i32
    %354 = tpu.dynamic_rotate %339 by %c2_i32_65 dim 0 : vector<8x512xf32>, i32 -> vector<8x512xf32>
    %355 = vector.extract_strided_slice %3 {offsets = [0, 31], sizes = [8, 1], strides = [1, 1]} : vector<8x36xf32> to vector<8x1xf32>
    %356 = vector.broadcast %355 : vector<8x1xf32> to vector<8x512xf32>
    %357 = arith.mulf %354, %356 : vector<8x512xf32>
    %358 = arith.addf %338, %357 : vector<8x512xf32>
    %c443_i32 = arith.constant 443 : i32
    %359 = tpu.dynamic_rotate %195 by %c443_i32 dim 1 : vector<8x512xf32>, i32 -> vector<8x512xf32>
    %360 = vector.extract_strided_slice %3 {offsets = [0, 32], sizes = [8, 1], strides = [1, 1]} : vector<8x36xf32> to vector<8x1xf32>
    %361 = vector.broadcast %360 : vector<8x1xf32> to vector<8x512xf32>
    %362 = arith.mulf %359, %361 : vector<8x512xf32>
    %363 = arith.addf %343, %362 : vector<8x512xf32>
    %c6_i32_66 = arith.constant 6 : i32
    %364 = tpu.dynamic_rotate %359 by %c6_i32_66 dim 0 : vector<8x512xf32>, i32 -> vector<8x512xf32>
    %365 = vector.extract_strided_slice %3 {offsets = [0, 33], sizes = [8, 1], strides = [1, 1]} : vector<8x36xf32> to vector<8x1xf32>
    %366 = vector.broadcast %365 : vector<8x1xf32> to vector<8x512xf32>
    %367 = arith.mulf %364, %366 : vector<8x512xf32>
    %368 = arith.addf %348, %367 : vector<8x512xf32>
    %c4_i32_67 = arith.constant 4 : i32
    %369 = tpu.dynamic_rotate %359 by %c4_i32_67 dim 0 : vector<8x512xf32>, i32 -> vector<8x512xf32>
    %370 = vector.extract_strided_slice %3 {offsets = [0, 34], sizes = [8, 1], strides = [1, 1]} : vector<8x36xf32> to vector<8x1xf32>
    %371 = vector.broadcast %370 : vector<8x1xf32> to vector<8x512xf32>
    %372 = arith.mulf %369, %371 : vector<8x512xf32>
    %373 = arith.addf %353, %372 : vector<8x512xf32>
    %c2_i32_68 = arith.constant 2 : i32
    %374 = tpu.dynamic_rotate %359 by %c2_i32_68 dim 0 : vector<8x512xf32>, i32 -> vector<8x512xf32>
    %375 = vector.extract_strided_slice %3 {offsets = [0, 35], sizes = [8, 1], strides = [1, 1]} : vector<8x36xf32> to vector<8x1xf32>
    %376 = vector.broadcast %375 : vector<8x1xf32> to vector<8x512xf32>
    %377 = arith.mulf %374, %376 : vector<8x512xf32>
    %378 = arith.addf %358, %377 : vector<8x512xf32>
    %379 = arith.addf %363, %368 : vector<8x512xf32>
    %380 = arith.addf %373, %378 : vector<8x512xf32>
    %381 = arith.addf %379, %380 : vector<8x512xf32>
    %c0_69 = arith.constant 0 : index
    %c0_70 = arith.constant 0 : index
    %382 = vector.load %arg5[%c0_69, %c0_70] : memref<8x1xf32, #tpu.memory_space<vmem>>, vector<8x1xf32>
    %383 = vector.broadcast %382 : vector<8x1xf32> to vector<8x512xf32>
    %384 = arith.addf %381, %383 : vector<8x512xf32>
    %c0_71 = arith.constant 0 : index
    %c0_72 = arith.constant 0 : index
    %c0_73 = arith.constant 0 : index
    %385 = vector.load %arg7[%c0_71, %c0_72, %c0_73] : memref<1x8x512xf32, #tpu.memory_space<vmem>>, vector<1x8x512xf32>
    %386 = vector.shape_cast %385 : vector<1x8x512xf32> to vector<8x512xf32>
    %387 = vector.shape_cast %384 : vector<8x512xf32> to vector<1x8x512xf32>
    tpu.vector_store %arg7[%c0_71, %c0_72, %c0_73], %387 {strides = array<i32>} : memref<1x8x512xf32, #tpu.memory_space<vmem>>, vector<1x8x512xf32>,
    return
  }
  func.func @transform_0(%arg0: i32) -> (i32, i32, i32) {
    %c0_i32 = arith.constant 0 : i32
    %c0_i32_0 = arith.constant 0 : i32
    %c0_i32_1 = arith.constant 0 : i32
    return %arg0, %c0_i32, %c0_i32_0 : i32, i32, i32
  }
  func.func @transform_1(%arg0: i32) -> (i32, i32) {
    %c0_i32 = arith.constant 0 : i32
    %c0_i32_0 = arith.constant 0 : i32
    %c0_i32_1 = arith.constant 0 : i32
    return %c0_i32, %c0_i32_0 : i32, i32
  }
  func.func @transform_2(%arg0: i32) -> (i32, i32) {
    %c0_i32 = arith.constant 0 : i32
    %c0_i32_0 = arith.constant 0 : i32
    %c0_i32_1 = arith.constant 0 : i32
    return %c0_i32, %c0_i32_0 : i32, i32
  }
  func.func @transform_3(%arg0: i32) -> (i32, i32) {
    %c0_i32 = arith.constant 0 : i32
    %c0_i32_0 = arith.constant 0 : i32
    %c0_i32_1 = arith.constant 0 : i32
    return %c0_i32, %c0_i32_0 : i32, i32
  }
  func.func @transform_4(%arg0: i32) -> (i32, i32) {
    %c0_i32 = arith.constant 0 : i32
    %c0_i32_0 = arith.constant 0 : i32
    %c0_i32_1 = arith.constant 0 : i32
    return %c0_i32, %c0_i32_0 : i32, i32
  }
  func.func @transform_5(%arg0: i32) -> (i32, i32) {
    %c0_i32 = arith.constant 0 : i32
    %c0_i32_0 = arith.constant 0 : i32
    %c0_i32_1 = arith.constant 0 : i32
    return %c0_i32, %c0_i32_0 : i32, i32
  }
  func.func @transform_6(%arg0: i32) -> (i32, i32, i32) {
    %c0_i32 = arith.constant 0 : i32
    %c0_i32_0 = arith.constant 0 : i32
    %c0_i32_1 = arith.constant 0 : i32
    return %arg0, %c0_i32, %c0_i32_0 : i32, i32, i32
  }
}

</mosaic_0001>

<bundles_post_ra>
// kernel: _dblock_com_forward_impl.1
= control target key start
LH: loop header
LB: loop body
LE: loop exit
PB: predicated region body
PF: predicated region fallthrough
CT: control target
= control target key end

     0   :  { %v1524_v2 = vmov 1   ;;  %v2713_v3 = vmov 0   ;;  %s1526_s25 = smov 46   ;;  %v2728_v7 = vmov 2   ;;  %v2726_v8 = vmov 3   ;;  %s1538_s8 = smov 2   ;;  %s2687_s0 = inlined_call_operand.vmem [shape: f32[1,8,512], index: 0, kind: input, shape index: {}]   ;;  %s2688_s1 = inlined_call_operand.vmem [shape: f32[8,36], index: 1, kind: input, shape index: {}]   ;;  %s2689_s2 = inlined_call_operand.vmem [shape: f32[8,1], index: 2, kind: input, shape index: {}]   ;;  %s2690_s5 = inlined_call_operand.vmem [shape: f32[1,512], index: 5, kind: input, shape index: {}]   ;;  %s2691_s3 = inlined_call_operand.vmem [shape: f32[8,36], index: 3, kind: input, shape index: {}]   ;;  %s2692_s4 = inlined_call_operand.vmem [shape: f32[8,1], index: 4, kind: input, shape index: {}]   ;;  %s2693_s6 = inlined_call_operand.vmem [shape: f32[1,8,512], index: 6, kind: output, shape index: {}]  }
   0x1   :  { %v1614_v0 = vld [vmem:[%s2687_s0 + $0x10] sm:$0xff]  ;;  %v1619_v1 = vld [vmem:[%s2687_s0] sm:$0xff]  ;;  %1452 = vset.pattern.permute.xlu1 %v1524_v2  ;;  %1451 = vset.pattern.permute.xlu0 %v2713_v3  ;;  %v1628_v4 = vld [vmem:[%s2687_s0 + $0x18] sm:$0xff]  ;;  %v2727_v9 = vmov 4   ;;  %v2725_v10 = vmov 5   ;;  %v2724_v11 = vmov 7   ;;  %v2729_v52 = vlaneseq }
   0x2   :  { %34 = vrot.lane.b32.xlu1 %v1614_v0, %s1526_s25  ;;  %30 = vrot.lane.b32.xlu0 %v1619_v1, %s1526_s25  ;;  %v1633_v5 = vld [vmem:[%s2687_s0 + $0x8] sm:$0xff]  ;;  %v1640_v6 = vld [vmem:[%s2688_s1] sm:$0xff]  ;;  %s1529_s0 = smov 44   ;;  %s1533_s1 = smov 42   ;;  %v2723_v12 = vmov 8   ;;  %v2722_v13 = vmov 6  }
   0x3   :  { %v2721_v14 = vmov 11   ;;  %v2720_v15 = vmov 9   ;;  %v2719_v16 = vmov 12   ;;  %v2718_v17 = vmov 15   ;;  %s1544_s9 = smov 126   ;;  %s1546_s10 = smov 86  }
   0x4   :  { %v2716_v18 = vmov 10   ;;  %v2717_v19 = vmov 18   ;;  %v2714_v20 = vmov 13   ;;  %v2715_v21 = vmov 21   ;;  %s1553_s11 = smov 84   ;;  %s1557_s12 = smov 82  }
   0x5   :  { %v2711_v22 = vmov 24   ;;  %v2710_v23 = vmov 14   ;;  %v2708_v24 = vmov 16   ;;  %v2706_v25 = vmov 17   ;;  %s1569_s18 = smov 66   ;;  %s1571_s19 = smov 3  }
   0x6   :  { %36 = vrot.lane.b32.xlu1 %v1628_v4, %s1526_s25  ;;  %32 = vrot.lane.b32.xlu0 %v1633_v5, %s1526_s25  ;;  %v2709_v26 = vmov 27   ;;  %v2704_v27 = vmov 19   ;;  %v2707_v28 = vmov 28   ;;  %v2702_v29 = vmov 20   ;;  %s1572_s20 = smov 125   ;;  %s1573_s21 = smov 65  }
   0x7   :  { %v2705_v30 = vmov 31   ;;  %v2703_v31 = vmov 32   ;;  %v2700_v32 = vmov 22   ;;  %v2701_v33 = vmov 35   ;;  %s1574_s22 = smov 62   ;;  %s1575_s23 = smov 59  }
   0x8   :  { %v2699_v34 = vmov 23   ;;  %v2698_v35 = vmov 25   ;;  %v2697_v40 = vmov 26   ;;  %v2696_v43 = vmov 29  }
   0x9   :  { %v2695_v51 = vmov 30   ;;  %v1774_v55 = vand.u32 127, %v2729_v52  ;;  %v2694_v57 = vmov 33  }
   0xa   :  { %63 = vperm.xlu1 %1452, %v1640_v6   ;;  %47 = vperm.xlu0 %1451, %v1640_v6  }
   0xb   :  { %vm114_vm0 = vcmp.lt.s32.totalorder %v1774_v55, 44  ;;  %vm40_vm1 = vcmp.lt.s32.totalorder %v1774_v55, 46  ;;  %vm187_vm2 = vcmp.lt.s32.totalorder %v1774_v55, 42  ;;  %vm260_vm3 = vcmp.lt.s32.totalorder %v1774_v55, 2 }
   0xc   :  { %vm393_vm4 = vcmp.lt.s32.totalorder %v1774_v55, 126  ;;  %vm466_vm5 = vcmp.lt.s32.totalorder %v1774_v55, 86  ;;  %vm539_vm6 = vcmp.lt.s32.totalorder %v1774_v55, 84  ;;  %vm612_vm7 = vcmp.lt.s32.totalorder %v1774_v55, 82 }
   0xd   :  { %vm732_vm8 = vcmp.lt.s32.totalorder %v1774_v55, 69  ;;  %vm806_vm9 = vcmp.lt.s32.totalorder %v1774_v55, 66  ;;  %vm879_vm10 = vcmp.lt.s32.totalorder %v1774_v55, 63  ;;  %vm952_vm11 = vcmp.lt.s32.totalorder %v1774_v55, 3 }
   0xe   :  { %1453 = vset.pattern.permute.xlu1 %v2728_v7  ;;  %1454 = vset.pattern.permute.xlu0 %v2726_v8  ;;  %vm1085_vm12 = vcmp.lt.s32.totalorder %v1774_v55, 125  ;;  %vm1158_vm13 = vcmp.lt.s32.totalorder %v1774_v55, 65  ;;  %vm1231_vm14 = vcmp.lt.s32.totalorder %v1774_v55, 62  ;;  %vm1304_vm15 = vcmp.lt.s32.totalorder %v1774_v55, 59 }
   0xf   :  { %79 = vperm.xlu1 %1453, %v1640_v6   ;;  %95 = vperm.xlu0 %1454, %v1640_v6  }
  0x13   :  { %106 = vrot.lane.b32.xlu1 %v1619_v1, %s1529_s0  ;;  %110 = vrot.lane.b32.xlu0 %v1614_v0, %s1529_s0 }
  0x14   :  { %1455 = vset.pattern.permute.xlu0 %v2727_v9  ;;  %1456 = vset.pattern.permute.xlu1 %v2725_v10 }
  0x17   :  { %108 = vrot.lane.b32.xlu1 %v1633_v5, %s1529_s0  ;;  %120 = vperm.xlu0 %1455, %v1640_v6  }
  0x1b   :  { %112 = vrot.lane.b32.xlu1 %v1628_v4, %s1529_s0  ;;  %1458 = vset.pattern.permute.xlu0 %v2724_v11 }
  0x1c   :  { %168 = vperm.xlu0 %1458, %v1640_v6  }
  0x1f   :  { %136 = vperm.xlu1 %1456, %v1640_v6  }
  0x20   :  { %183 = vrot.lane.b32.xlu0 %v1614_v0, %s1533_s1 }
  0x21   :  { %1459 = vset.pattern.permute.xlu0 %v2723_v12 }
  0x23   :  { %1457 = vset.pattern.permute.xlu1 %v2722_v13 }
  0x24   :  { %152 = vperm.xlu1 %1457, %v1640_v6   ;;  %193 = vperm.xlu0 %1459, %v1640_v6  }
  0x28   :  { %179 = vrot.lane.b32.xlu1 %v1619_v1, %s1533_s1  ;;  %1462 = vset.pattern.permute.xlu0 %v2721_v14 }
  0x29   :  { %241 = vperm.xlu0 %1462, %v1640_v6   ;;  %1460 = vset.pattern.permute.xlu1 %v2720_v15 }
  0x2c   :  { %181 = vrot.lane.b32.xlu1 %v1633_v5, %s1533_s1 }
  0x2d   :  { %256 = vrot.lane.b32.xlu0 %v1614_v0, %s1538_s8 }
  0x2e   :  { %1463 = vset.pattern.permute.xlu0 %v2719_v16 }
  0x30   :  { %185 = vrot.lane.b32.xlu1 %v1628_v4, %s1533_s1 }
  0x31   :  { %266 = vperm.xlu0 %1463, %v1640_v6  }
  0x34   :  { %209 = vperm.xlu1 %1460, %v1640_v6  }
  0x35   :  { %1466 = vset.pattern.permute.xlu0 %v2718_v17 }
  0x36   :  { %314 = vperm.xlu0 %1466, %v1640_v6  }
  0x38   :  { %1461 = vset.pattern.permute.xlu1 %v2716_v18 }
  0x39   :  { %225 = vperm.xlu1 %1461, %v1640_v6  }
  0x3a   :  { %1469 = vset.pattern.permute.xlu0 %v2717_v19 }
  0x3b   :  { %358 = vperm.xlu0 %1469, %v1640_v6  }
  0x3d   :  { %252 = vrot.lane.b32.xlu1 %v1619_v1, %s1538_s8 }
  0x3e   :  { %1464 = vset.pattern.permute.xlu1 %v2714_v20 }
  0x3f   :  { %387 = vrot.lane.b32.xlu0 %v1633_v5, %s1544_s9 }
  0x40   :  { %1472 = vset.pattern.permute.xlu0 %v2715_v21 }
  0x41   :  { %254 = vrot.lane.b32.xlu1 %v1633_v5, %s1538_s8 }
  0x43   :  { %391 = vrot.lane.b32.xlu0 %v1628_v4, %s1544_s9 }
  0x45   :  { %258 = vrot.lane.b32.xlu1 %v1628_v4, %s1538_s8 }
  0x47   :  { %415 = vperm.xlu0 %1472, %v1640_v6  }
  0x49   :  { %282 = vperm.xlu1 %1464, %v1640_v6  }
  0x4b   :  { %458 = vrot.lane.b32.xlu0 %v1619_v1, %s1546_s10 }
  0x4c   :  { %1475 = vset.pattern.permute.xlu0 %v2711_v22 }
  0x4d   :  { %1465 = vset.pattern.permute.xlu1 %v2710_v23 }
  0x4e   :  { %298 = vperm.xlu1 %1465, %v1640_v6  }
  0x4f   :  { %462 = vrot.lane.b32.xlu0 %v1614_v0, %s1546_s10 }
  0x52   :  { %1467 = vset.pattern.permute.xlu1 %v2708_v24 }
  0x53   :  { %326 = vperm.xlu1 %1467, %v1640_v6   ;;  %472 = vperm.xlu0 %1475, %v1640_v6  }
  0x57   :  { %1468 = vset.pattern.permute.xlu1 %v2706_v25  ;;  %1478 = vset.pattern.permute.xlu0 %v2709_v26 }
  0x58   :  { %342 = vperm.xlu1 %1468, %v1640_v6   ;;  %520 = vperm.xlu0 %1478, %v1640_v6  }
  0x5c   :  { %1470 = vset.pattern.permute.xlu1 %v2704_v27  ;;  %535 = vrot.lane.b32.xlu0 %v1614_v0, %s1553_s11 }
  0x5d   :  { %374 = vperm.xlu1 %1470, %v1640_v6   ;;  %1479 = vset.pattern.permute.xlu0 %v2707_v28 }
  0x60   :  { %545 = vperm.xlu0 %1479, %v1640_v6  }
  0x61   :  { %385 = vrot.lane.b32.xlu1 %v1619_v1, %s1544_s9 }
  0x62   :  { %1471 = vset.pattern.permute.xlu1 %v2702_v29 }
  0x64   :  { %1482 = vset.pattern.permute.xlu0 %v2705_v30 }
  0x65   :  { %389 = vrot.lane.b32.xlu1 %v1614_v0, %s1544_s9  ;;  %593 = vperm.xlu0 %1482, %v1640_v6  }
  0x69   :  { %399 = vperm.xlu1 %1471, %v1640_v6   ;;  %608 = vrot.lane.b32.xlu0 %v1614_v0, %s1557_s12 }
  0x6a   :  { %1483 = vset.pattern.permute.xlu0 %v2703_v31 }
  0x6d   :  { %1473 = vset.pattern.permute.xlu1 %v2700_v32  ;;  %618 = vperm.xlu0 %1483, %v1640_v6  }
  0x6e   :  { %431 = vperm.xlu1 %1473, %v1640_v6  }
  0x71   :  { %1486 = vset.pattern.permute.xlu0 %v2701_v33 }
  0x72   :  { %1474 = vset.pattern.permute.xlu1 %v2699_v34  ;;  %666 = vperm.xlu0 %1486, %v1640_v6  }
  0x73   :  { %447 = vperm.xlu1 %1474, %v1640_v6  }
  0x74   :  { %v35_v36 = vpop.permute.xlu1 %34  ;;  %v1732_v37 = vpop.permute.xlu0 %30 }
  0x76   :  { %1488 = vset.pattern.permute.xlu0 %v1524_v2 }
  0x77   :  { %460 = vrot.lane.b32.xlu1 %v1633_v5, %s1546_s10 }
  0x78   :  { %1476 = vset.pattern.permute.xlu1 %v2698_v35  ;;  %v1737_v38 = vpop.permute.xlu1 %36  ;;  %v1739_v39 = vpop.permute.xlu0 %32 }
  0x79   :  { %v1797_v62 = vsel %vm40_vm1, %v1739_v39, %v35_v36 }
  0x7a   :  { %v60_v11 = vrot.slane %v1797_v62, 2  ;;  %v76_v17 = vrot.slane %v1797_v62, 4 }
  0x7b   :  { %464 = vrot.lane.b32.xlu1 %v1628_v4, %s1546_s10 }
  0x7f   :  { %488 = vperm.xlu1 %1476, %v1640_v6  }
  0x83   :  { %1477 = vset.pattern.permute.xlu1 %v2697_v40  ;;  %v92_v40 = vrot.slane %v1797_v62, 6 }
  0x84   :  { %504 = vperm.xlu1 %1477, %v1640_v6  }
  0x85   :  { %v1743_v41 = vpop.permute.xlu1 %63  ;;  %v1745_v42 = vpop.permute.xlu0 %47 }
  0x86   :  { %v68_v13 = vmul.f32 %v1743_v41, %v60_v11 }
  0x88   :  { %531 = vrot.lane.b32.xlu1 %v1619_v1, %s1553_s11 }
  0x89   :  { %1480 = vset.pattern.permute.xlu1 %v2696_v43 }
  0x8a   :  { %v1750_v44 = vpop.permute.xlu1 %79  ;;  %v1752_v45 = vpop.permute.xlu0 %95 }
  0x8b   :  { %v100_v27 = vmul.f32 %v1752_v45, %v92_v40 }
  0x8c   :  { %533 = vrot.lane.b32.xlu1 %v1633_v5, %s1553_s11 }
  0x8e   :  { %v1756_v46 = vpop.permute.xlu1 %106  ;;  %v111_v47 = vpop.permute.xlu0 %110 }
  0x90   :  { %537 = vrot.lane.b32.xlu1 %v1628_v4, %s1553_s11 }
  0x92   :  { %v1760_v48 = vpop.permute.xlu1 %108  ;;  %v1762_v49 = vpop.permute.xlu0 %120 }
  0x93   :  { %v1788_v59 = vsel %vm114_vm0, %v1760_v48, %v111_v47 }
  0x94   :  { %561 = vperm.xlu1 %1480, %v1640_v6   ;;  %v125_v63 = vmul.f32 %v1762_v49, %v1788_v59  ;;  %v165_v2 = vrot.slane %v1788_v59, 6 }
  0x96   :  { %v1765_v50 = vpop.permute.xlu1 %112 }
  0x97   :  { %v1768_v53 = vpop.permute.xlu0 %168  ;;  %v118_v8 = vsel %vm114_vm0, %v1765_v50, %v1756_v46 }
  0x98   :  { %1481 = vset.pattern.permute.xlu1 %v2695_v51  ;;  %v52_v51 = vmul.f32 %v1745_v42, %v1797_v62  ;;  %v173_v35 = vmul.f32 %v1768_v53, %v165_v2  ;;  %v1832_v2 = vsel %vm40_vm1, %v35_v36, %v1737_v38 }
  0x99   :  { %577 = vperm.xlu1 %1481, %v1640_v6   ;;  %v93_v36 = vrot.slane %v1832_v2, 6  ;;  %v61_v15 = vrot.slane %v1832_v2, 2  ;;  %v77_v9 = vrot.slane %v1832_v2, 4 }
  0x9a   :  { %v1771_v54 = vpop.permute.xlu1 %136  ;;  %v129_v32 = vadd.f32 %v125_v63, %v52_v51  ;;  %v53_v63 = vmul.f32 %v1745_v42, %v1832_v2  ;;  %v177_v28 = vadd.f32 %v173_v35, %v100_v27 }
  0x9b   :  { %v184_v56 = vpop.permute.xlu0 %183  ;;  %v101_v27 = vmul.f32 %v1752_v45, %v93_v36  ;;  %v69_v2 = vmul.f32 %v1743_v41, %v61_v15 }
  0x9d   :  { %604 = vrot.lane.b32.xlu1 %v1619_v1, %s1557_s12 }
  0x9e   :  { %1484 = vset.pattern.permute.xlu1 %v2694_v57  ;;  %v1808_v57 = vsel %vm114_vm0, %v111_v47, %v1765_v50 }
  0x9f   :  { %v1780_v58 = vpop.permute.xlu1 %152  ;;  %v1792_v61 = vpop.permute.xlu0 %193  ;;  %v126_v33 = vmul.f32 %v1762_v49, %v1808_v57  ;;  %v166_v47 = vrot.slane %v1808_v57, 6 }
  0xa1   :  { %606 = vrot.lane.b32.xlu1 %v1633_v5, %s1557_s12  ;;  %v130_v40 = vadd.f32 %v126_v33, %v53_v63  ;;  %v174_v23 = vmul.f32 %v1768_v53, %v166_v47  ;;  %v689_v33 = vld [vmem:[%s2689_s2] sm:$0xff] }
  0xa3   :  { %v1790_v60 = vpop.permute.xlu1 %179  ;;  %v178_v47 = vadd.f32 %v174_v23, %v101_v27  ;;  %v43_v23 = vsel %vm40_vm1, %v1732_v37, %v1739_v39  ;;  %v44_v27 = vsel %vm40_vm1, %v1737_v38, %v1732_v37  ;;  %v117_v39 = vsel %vm114_vm0, %v1756_v46, %v1760_v48 }
  0xa4   :  { %v1827_v31 = vpop.permute.xlu0 %241  ;;  %v59_v19 = vrot.slane %v43_v23, 2  ;;  %v58_v16 = vrot.slane %v44_v27, 2  ;;  %v74_v12 = vrot.slane %v44_v27, 4  ;;  %v75_v10 = vrot.slane %v43_v23, 4 }
  0xa5   :  { %610 = vrot.lane.b32.xlu1 %v1628_v4, %s1557_s12  ;;  %v90_v7 = vrot.slane %v44_v27, 6  ;;  %v91_v38 = vrot.slane %v43_v23, 6  ;;  %v50_v62 = vmul.f32 %v1745_v42, %v44_v27  ;;  %v131_v37 = vrot.slane %v118_v8, 2 }
  0xa6   :  { %v66_v18 = vmul.f32 %v1743_v41, %v58_v16  ;;  %v67_v14 = vmul.f32 %v1743_v41, %v59_v19  ;;  %v51_v16 = vmul.f32 %v1745_v42, %v43_v23  ;;  %v82_v19 = vmul.f32 %v1750_v44, %v74_v12 }
  0xa7   :  { %v1812_v43 = vpop.permute.xlu1 %181  ;;  %v83_v11 = vmul.f32 %v1750_v44, %v75_v10  ;;  %v84_v46 = vmul.f32 %v1750_v44, %v76_v17  ;;  %v85_v48 = vmul.f32 %v1750_v44, %v77_v9  ;;  %v132_v15 = vrot.slane %v117_v39, 2 }
  0xa8   :  { %v1819_v34 = vsel %vm187_vm2, %v1812_v43, %v184_v56  ;;  %v133_v41 = vrot.slane %v1788_v59, 2  ;;  %v124_v27 = vmul.f32 %v1762_v49, %v117_v39  ;;  %v123_v42 = vmul.f32 %v1762_v49, %v118_v8 }
  0xa9   :  { %v198_v29 = vmul.f32 %v1792_v61, %v1819_v34  ;;  %634 = vperm.xlu1 %1484, %v1640_v6   ;;  %v238_v51 = vrot.slane %v1819_v34, 6  ;;  %v147_v23 = vrot.slane %v118_v8, 4  ;;  %v139_v52 = vmul.f32 %v1771_v54, %v131_v37 }
  0xaa   :  { %v140_v9 = vmul.f32 %v1771_v54, %v132_v15  ;;  %v141_v44 = vmul.f32 %v1771_v54, %v133_v41  ;;  %v190_v49 = vsel %vm187_vm2, %v1790_v60, %v1812_v43  ;;  %v128_v15 = vadd.f32 %v124_v27, %v51_v16 }
  0xab   :  { %v1838_v30 = vadd.f32 %v198_v29, %v129_v32  ;;  %v1840_v25 = vpop.permute.xlu1 %185  ;;  %v246_v24 = vmul.f32 %v1827_v31, %v238_v51  ;;  %v2712_v29 = vmov 34   ;;  %v127_v41 = vadd.f32 %v123_v42, %v50_v62 }
  0xac   :  { %v1846_v26 = vsel %vm187_vm2, %v184_v56, %v1840_v25  ;;  %v191_v37 = vsel %vm187_vm2, %v1840_v25, %v1790_v60  ;;  %v205_v16 = vrot.slane %v190_v49, 2  ;;  %v206_v27 = vrot.slane %v1819_v34, 2 }
  0xad   :  { %v199_v22 = vmul.f32 %v1792_v61, %v1846_v26  ;;  %1485 = vset.pattern.permute.xlu1 %v2712_v29  ;;  %v1853_v32 = vadd.f32 %v246_v24, %v177_v28  ;;  %v239_v56 = vrot.slane %v1846_v26, 6  ;;  %v236_v62 = vrot.slane %v191_v37, 6 }
  0xae   :  { %650 = vperm.xlu1 %1485, %v1640_v6  }
  0xaf   :  { %v1857_v35 = vadd.f32 %v199_v22, %v130_v40  ;;  %v1860_v51 = vpop.permute.xlu1 %209  ;;  %v247_v63 = vmul.f32 %v1827_v31, %v239_v56  ;;  %v1889_v56 = vpop.permute.xlu0 %256 }
  0xb1   :  { %2733 = vst [vmem:[#allocation2_spill] sm:$0xff] %v1857_v35  ;;  %v1867_v24 = vadd.f32 %v247_v63, %v178_v47  ;;  %v163_v63 = vrot.slane %v118_v8, 6  ;;  %v134_v47 = vrot.slane %v1808_v57, 2 }
  0xb2   :  { %1487 = vset.pattern.permute.xlu1 %v2713_v3  ;;  %v164_v3 = vrot.slane %v117_v39, 6 }
  0xb3   :  { %2734 = vst [vmem:[#allocation3_spill] sm:$0xff] %v1867_v24  ;;  %692 = vperm.xlu1 %1487, %v689_v33   ;;  %v1920_v21 = vpop.permute.xlu0 %266  ;;  %v99_v33 = vmul.f32 %v1752_v45, %v91_v38  ;;  %v171_v12 = vmul.f32 %v1768_v53, %v163_v63  ;;  %v142_v38 = vmul.f32 %v1771_v54, %v134_v47  ;;  %v150_v54 = vrot.slane %v1808_v57, 4 }
  0xb4   :  { %v1869_v6 = vpop.permute.xlu1 %225  ;;  %v172_v10 = vmul.f32 %v1768_v53, %v164_v3  ;;  %v98_v63 = vmul.f32 %v1752_v45, %v90_v7  ;;  %v148_v3 = vrot.slane %v117_v39, 4  ;;  %v149_v53 = vrot.slane %v1788_v59, 4 }
  0xb5   :  { %v155_v47 = vmul.f32 %v1780_v58, %v147_v23  ;;  %v144_v45 = vadd.f32 %v140_v9, %v67_v14  ;;  %v145_v59 = vadd.f32 %v141_v44, %v68_v13  ;;  %v146_v39 = vadd.f32 %v142_v38, %v69_v2 }
  0xb6   :  { %v176_v43 = vadd.f32 %v172_v10, %v99_v33  ;;  %v204_v24 = vrot.slane %v191_v37, 2  ;;  %v156_v25 = vmul.f32 %v1780_v58, %v148_v3  ;;  %v157_v60 = vmul.f32 %v1780_v58, %v149_v53 }
  0xb7   :  { %v1948_v8 = vpop.permute.xlu0 %314  ;;  %v207_v57 = vrot.slane %v1846_v26, 2  ;;  %v158_v33 = vmul.f32 %v1780_v58, %v150_v54  ;;  %v221_v14 = vrot.slane %v190_v49, 4  ;;  %v222_v13 = vrot.slane %v1819_v34, 4 }
  0xb8   :  { %v1871_v22 = vpop.permute.xlu1 %252  ;;  %v196_v23 = vmul.f32 %v1792_v61, %v191_v37  ;;  %v223_v10 = vrot.slane %v1846_v26, 4  ;;  %v212_v58 = vmul.f32 %v1860_v51, %v204_v24  ;;  %v244_v9 = vmul.f32 %v1827_v31, %v236_v62 }
  0xb9   :  { %v213_v44 = vmul.f32 %v1860_v51, %v205_v16  ;;  %v214_v38 = vmul.f32 %v1860_v51, %v206_v27  ;;  %v215_v34 = vmul.f32 %v1860_v51, %v207_v57  ;;  %v2738_v3 = vlaneseq }
  0xba   :  { %v229_v24 = vmul.f32 %v1869_v6, %v221_v14  ;;  %v230_v53 = vmul.f32 %v1869_v6, %v222_v13  ;;  %v1989_v62 = vadd.f32 %v196_v23, %v127_v41  ;;  %v2739_v57 = vrot.slane %v1619_v1, 4 }
  0xbb   :  { %v359_v35 = vpop.permute.xlu0 %358  ;;  %v2741_v13 = vrot.slane %v1614_v0, 4 }
  0xbc   :  { %v1873_v28 = vpop.permute.xlu1 %254 }
  0xc0   :  { %v1875_v36 = vpop.permute.xlu1 %258 }
  0xc4   :  { %v1877_v40 = vpop.permute.xlu1 %282 }
  0xc9   :  { %v1879_v29 = vpop.permute.xlu1 %298 }
  0xce   :  { %v1895_v20 = vpop.permute.xlu1 %326 }
  0xcf   :  { %2735 = vst [vmem:[#allocation4_spill] sm:$0xff] %v1895_v20  ;;  %v237_v20 = vrot.slane %v190_v49, 6 }
  0xd1   :  { %v245_v2 = vmul.f32 %v1827_v31, %v237_v20  ;;  %v160_v20 = vadd.f32 %v156_v25, %v83_v11  ;;  %v231_v31 = vmul.f32 %v1869_v6, %v223_v10  ;;  %v1999_v25 = vadd.f32 %v215_v34, %v146_v39 }
  0xd3   :  { %v1922_v50 = vpop.permute.xlu1 %342 }
  0xd4   :  { %2736 = vst [vmem:[#allocation5_spill] sm:$0xff] %v1922_v50  ;;  %v143_v50 = vadd.f32 %v139_v52, %v66_v18  ;;  %v159_v18 = vadd.f32 %v155_v47, %v82_v19  ;;  %v197_v52 = vmul.f32 %v1792_v61, %v190_v49  ;;  %v1974_v19 = vpop.permute.xlu0 %387  ;;  %v161_v49 = vadd.f32 %v157_v60, %v84_v46 }
  0xd5   :  { %v1981_v61 = vshrl.u32 %v2738_v3, 7  ;;  %v249_v47 = vadd.f32 %v245_v2, %v176_v43  ;;  %v1995_v46 = vadd.f32 %v213_v44, %v144_v45  ;;  %v233_v45 = vadd.f32 %v229_v24, %v160_v20 }
  0xd6   :  { %v201_v54 = vadd.f32 %v197_v52, %v128_v15  ;;  %v1991_v51 = vadd.f32 %v212_v58, %v143_v50  ;;  %v263_v15 = vsel %vm260_vm3, %v1871_v22, %v1873_v28  ;;  %v261_v60 = vsel %vm260_vm3, %v1889_v56, %v1875_v36 }
  0xd7   :  { %v2740_v52 = vrot.slane %v1633_v5, 4  ;;  %v270_v27 = vmul.f32 %v1920_v21, %v263_v15  ;;  %v2742_v2 = vrot.slane %v1628_v4, 4  ;;  %v278_v34 = vrot.slane %v263_v15, 2 }
  0xd8   :  { %v1939_v17 = vpop.permute.xlu1 %374  ;;  %v2009_v50 = vpop.permute.xlu0 %391 }
  0xd9   :  { %2737 = vst [vmem:[#allocation6_spill] sm:$0xff] %v1939_v17  ;;  %v175_v17 = vadd.f32 %v171_v12, %v98_v63  ;;  %v220_v12 = vrot.slane %v191_v37, 4  ;;  %v162_v63 = vadd.f32 %v158_v33, %v85_v48  ;;  %v1997_v48 = vadd.f32 %v214_v38, %v145_v59 }
  0xda   :  { %v234_v59 = vadd.f32 %v230_v53, %v161_v49  ;;  %v361_v33 = vmul.f32 %v359_v35, %v2739_v57  ;;  %v362_v16 = vmul.f32 %v359_v35, %v2740_v52  ;;  %v364_v23 = vmul.f32 %v359_v35, %v2742_v2 }
  0xdb   :  { %v228_v26 = vmul.f32 %v1869_v6, %v220_v12  ;;  %v1993_v11 = vadd.f32 %v244_v9, %v175_v17  ;;  %v262_v6 = vsel %vm260_vm3, %v1873_v28, %v1889_v56  ;;  %v702_v17 = vsub.s32 0, %v1981_v61 }
  0xdc   :  { %v1959_v7 = vpop.permute.xlu1 %385  ;;  %v235_v39 = vadd.f32 %v231_v31, %v162_v63  ;;  %v264_v28 = vsel %vm260_vm3, %v1875_v36, %v1871_v22  ;;  %v271_v14 = vmul.f32 %v1920_v21, %v262_v6  ;;  %v363_v56 = vmul.f32 %v359_v35, %v2741_v13  ;;  %v2034_v3 = vpop.permute.xlu0 %415 }
  0xdd   :  { %v232_v43 = vadd.f32 %v228_v26, %v159_v18  ;;  %v294_v22 = vrot.slane %v263_v15, 4  ;;  %v295_v36 = vrot.slane %v262_v6, 4  ;;  %v310_v12 = vrot.slane %v263_v15, 6 }
  0xde   :  { %v311_v10 = vrot.slane %v262_v6, 6  ;;  %v277_v58 = vrot.slane %v264_v28, 2  ;;  %v280_v9 = vrot.slane %v261_v60, 2  ;;  %v293_v44 = vrot.slane %v264_v28, 4 }
  0xdf   :  { %v296_v38 = vrot.slane %v261_v60, 4  ;;  %v279_v20 = vrot.slane %v262_v6, 2  ;;  %v309_v49 = vrot.slane %v264_v28, 6  ;;  %v312_v63 = vrot.slane %v261_v60, 6 }
  0xe0   :  { %v1969_v42 = vpop.permute.xlu1 %389  ;;  %v301_v26 = vmul.f32 %v1879_v29, %v293_v44  ;;  %v302_v35 = vmul.f32 %v1879_v29, %v294_v22  ;;  %v303_v24 = vmul.f32 %v1879_v29, %v295_v36  ;;  %v318_v57 = vmul.f32 %v1948_v8, %v310_v12 }
  0xe1   :  { %v304_v53 = vmul.f32 %v1879_v29, %v296_v38  ;;  %v319_v52 = vmul.f32 %v1948_v8, %v311_v10  ;;  %v269_v6 = vmul.f32 %v1920_v21, %v264_v28  ;;  %v272_v15 = vmul.f32 %v1920_v21, %v261_v60  ;;  %v2053_v10 = vpop.permute.xlu0 %458 }
  0xe2   :  { %v285_v13 = vmul.f32 %v1877_v40, %v277_v58  ;;  %v286_v2 = vmul.f32 %v1877_v40, %v278_v34  ;;  %v287_v22 = vmul.f32 %v1877_v40, %v279_v20  ;;  %v288_v36 = vmul.f32 %v1877_v40, %v280_v9 }
  0xe3   :  { %v274_v44 = vadd.f32 %v270_v27, %v201_v54  ;;  %v275_v29 = vadd.f32 %v271_v14, %v1838_v30  ;;  %v317_v38 = vmul.f32 %v1948_v8, %v309_v49  ;;  %v320_v12 = vmul.f32 %v1948_v8, %v312_v63  ;;  %v2743_v54 = vld [vmem:[#allocation2_spill] sm:$0xff] }
  0xe4   :  { %v1987_v37 = vpop.permute.xlu1 %399  ;;  %v305_v28 = vadd.f32 %v301_v26, %v232_v43  ;;  %v306_v41 = vadd.f32 %v302_v35, %v233_v45  ;;  %v307_v21 = vadd.f32 %v303_v24, %v234_v59  ;;  %v308_v60 = vadd.f32 %v304_v53, %v235_v39  ;;  %v2744_v59 = vld [vmem:[#allocation3_spill] sm:$0xff] }
  0xe5   :  { %v322_v34 = vadd.f32 %v318_v57, %v249_v47  ;;  %v323_v20 = vadd.f32 %v319_v52, %v1853_v32  ;;  %v273_v40 = vadd.f32 %v269_v6, %v1989_v62  ;;  %v276_v27 = vadd.f32 %v272_v15, %v2743_v54 }
  0xe6   :  { %v289_v30 = vadd.f32 %v285_v13, %v1991_v51  ;;  %v290_v14 = vadd.f32 %v286_v2, %v1995_v46  ;;  %v291_v8 = vadd.f32 %v287_v22, %v1997_v48  ;;  %v292_v43 = vadd.f32 %v288_v36, %v1999_v25  ;;  %v2745_v25 = vld [vmem:[#allocation4_spill] sm:$0xff]  ;;  %v2752_v22 = vld [vmem:[#allocation6_spill] sm:$0xff] }
  0xe7   :  { %v321_v45 = vadd.f32 %v317_v38, %v1993_v11  ;;  %v324_v39 = vadd.f32 %v320_v12, %v2744_v59  ;;  %v2070_v32 = vsel %vm393_vm4, %v1959_v7, %v1974_v19  ;;  %v2076_v47 = vsel %vm393_vm4, %v2009_v50, %v1959_v7 }
  0xe8   :  { %v2078_v62 = vadd.f32 %v361_v33, %v305_v28  ;;  %v2080_v51 = vadd.f32 %v362_v16, %v306_v41  ;;  %v2082_v46 = vadd.f32 %v363_v56, %v307_v21  ;;  %v2084_v11 = vadd.f32 %v364_v23, %v308_v60  ;;  %v2096_v41 = vpop.permute.xlu0 %462  ;;  %v2747_v56 = vld [vmem:[#allocation5_spill] sm:$0xff] }
  0xe9   :  { %v2025_v18 = vpop.permute.xlu1 %431  ;;  %v329_v9 = vmul.f32 %v2745_v25, %v1619_v1  ;;  %v330_v49 = vmul.f32 %v2745_v25, %v1633_v5  ;;  %v331_v7 = vmul.f32 %v2745_v25, %v1614_v0  ;;  %v332_v33 = vmul.f32 %v2745_v25, %v1628_v4 }
  0xea   :  { %v2746_v16 = vrot.slane %v1619_v1, 2  ;;  %v2748_v63 = vrot.slane %v1633_v5, 2  ;;  %v410_v35 = vrot.slane %v2070_v32, 2  ;;  %v413_v24 = vrot.slane %v2076_v47, 2 }
  0xeb   :  { %v2749_v53 = vrot.slane %v1614_v0, 2  ;;  %v2750_v52 = vrot.slane %v1628_v4, 2  ;;  %v394_v15 = vsel %vm393_vm4, %v1969_v42, %v2009_v50  ;;  %v395_v13 = vsel %vm393_vm4, %v1974_v19, %v1969_v42 }
  0xec   :  { %v345_v23 = vmul.f32 %v2747_v56, %v2746_v16  ;;  %v346_v26 = vmul.f32 %v2747_v56, %v2748_v63  ;;  %v2751_v2 = vrot.slane %v1619_v1, 6  ;;  %v2753_v38 = vrot.slane %v1633_v5, 6 }
  0xed   :  { %v347_v57 = vmul.f32 %v2747_v56, %v2749_v53  ;;  %v348_v6 = vmul.f32 %v2747_v56, %v2750_v52  ;;  %v2754_v28 = vrot.slane %v1614_v0, 6  ;;  %v2755_v60 = vrot.slane %v1628_v4, 6 }
  0xee   :  { %v2040_v31 = vpop.permute.xlu1 %447  ;;  %v377_v36 = vmul.f32 %v2752_v22, %v2751_v2  ;;  %v378_v12 = vmul.f32 %v2752_v22, %v2753_v38  ;;  %v333_v59 = vadd.f32 %v329_v9, %v273_v40  ;;  %v334_v42 = vadd.f32 %v330_v49, %v274_v44  ;;  %v2137_v2 = vpop.permute.xlu0 %472 }
  0xef   :  { %v379_v21 = vmul.f32 %v2752_v22, %v2754_v28  ;;  %v380_v50 = vmul.f32 %v2752_v22, %v2755_v60  ;;  %v335_v19 = vadd.f32 %v331_v7, %v275_v29  ;;  %v336_v1 = vadd.f32 %v332_v33, %v276_v27 }
  0xf0   :  { %v418_v25 = vmul.f32 %v2034_v3, %v410_v35  ;;  %v421_v5 = vmul.f32 %v2034_v3, %v413_v24  ;;  %v411_v16 = vrot.slane %v395_v13, 2  ;;  %v412_v56 = vrot.slane %v394_v15, 2 }
  0xf1   :  { %v350_v63 = vadd.f32 %v346_v26, %v290_v14  ;;  %v351_v0 = vadd.f32 %v347_v57, %v291_v8  ;;  %v352_v53 = vadd.f32 %v348_v6, %v292_v43  ;;  %v349_v52 = vadd.f32 %v345_v23, %v289_v30 }
  0xf2   :  { %v2055_v58 = vpop.permute.xlu1 %460  ;;  %v381_v4 = vadd.f32 %v377_v36, %v321_v45  ;;  %v382_v22 = vadd.f32 %v378_v12, %v322_v34  ;;  %v383_v38 = vadd.f32 %v379_v21, %v323_v20  ;;  %v384_v28 = vadd.f32 %v380_v50, %v324_v39  ;;  %v521_v24 = vpop.permute.xlu0 %520 }
  0xf3   :  { %v426_v44 = vrot.slane %v2070_v32, 4  ;;  %v429_v29 = vrot.slane %v2076_v47, 4  ;;  %v442_v40 = vrot.slane %v2070_v32, 6  ;;  %v445_v27 = vrot.slane %v2076_v47, 6 }
  0xf4   :  { %v2145_v14 = vadd.f32 %v418_v25, %v349_v52  ;;  %v2147_v8 = vadd.f32 %v421_v5, %v352_v53  ;;  %v419_v30 = vmul.f32 %v2034_v3, %v411_v16  ;;  %v420_v34 = vmul.f32 %v2034_v3, %v412_v56 }
  0xf5   :  { %v427_v20 = vrot.slane %v395_v13, 4  ;;  %v428_v43 = vrot.slane %v394_v15, 4  ;;  %v402_v45 = vmul.f32 %v1987_v37, %v2070_v32  ;;  %v403_v39 = vmul.f32 %v1987_v37, %v395_v13 }
  0xf6   :  { %v2086_v48 = vpop.permute.xlu1 %464  ;;  %v443_v49 = vrot.slane %v395_v13, 6  ;;  %v444_v7 = vrot.slane %v394_v15, 6  ;;  %v404_v33 = vmul.f32 %v1987_v37, %v394_v15  ;;  %v405_v23 = vmul.f32 %v1987_v37, %v2076_v47 }
  0xf7   :  { %v434_v26 = vmul.f32 %v2025_v18, %v426_v44  ;;  %v435_v35 = vmul.f32 %v2025_v18, %v427_v20  ;;  %v2163_v3 = vsel %vm466_vm5, %v2055_v58, %v2096_v41  ;;  %v469_v32 = vsel %vm466_vm5, %v2053_v10, %v2055_v58 }
  0xf8   :  { %v2171_v6 = vadd.f32 %v419_v30, %v350_v63  ;;  %v2173_v37 = vadd.f32 %v420_v34, %v351_v0  ;;  %v436_v47 = vmul.f32 %v2025_v18, %v428_v43  ;;  %v437_v15 = vmul.f32 %v2025_v18, %v429_v29 }
  0xf9   :  { %v406_v13 = vadd.f32 %v402_v45, %v333_v59  ;;  %v407_v36 = vadd.f32 %v403_v39, %v334_v42  ;;  %v452_v12 = vmul.f32 %v2040_v31, %v444_v7  ;;  %v453_v21 = vmul.f32 %v2040_v31, %v445_v27  ;;  %v536_v59 = vpop.permute.xlu0 %535 }
  0xfa   :  { %v2133_v54 = vpop.permute.xlu1 %488  ;;  %v450_v60 = vmul.f32 %v2040_v31, %v442_v40  ;;  %v451_v58 = vmul.f32 %v2040_v31, %v443_v49  ;;  %v515_v50 = vrot.slane %v469_v32, 6  ;;  %v516_v25 = vrot.slane %v2163_v3, 6 }
  0xfb   :  { %v408_v5 = vadd.f32 %v404_v33, %v335_v19  ;;  %v409_v16 = vadd.f32 %v405_v23, %v336_v1  ;;  %v2184_v56 = vadd.f32 %v434_v26, %v2078_v62  ;;  %v2187_v18 = vadd.f32 %v435_v35, %v2080_v51 }
  0xfc   :  { %v2190_v63 = vadd.f32 %v436_v47, %v2082_v46  ;;  %v2193_v31 = vadd.f32 %v437_v15, %v2084_v11  ;;  %v467_v19 = vsel %vm466_vm5, %v2096_v41, %v2086_v48  ;;  %v470_v62 = vsel %vm466_vm5, %v2086_v48, %v2053_v10 }
  0xfd   :  { %v456_v51 = vadd.f32 %v452_v12, %v383_v38  ;;  %v457_v1 = vadd.f32 %v453_v21, %v384_v28  ;;  %v475_v0 = vmul.f32 %v2137_v2, %v469_v32  ;;  %v476_v46 = vmul.f32 %v2137_v2, %v2163_v3 }
  0xfe   :  { %v455_v53 = vadd.f32 %v451_v58, %v382_v22  ;;  %v454_v11 = vadd.f32 %v450_v60, %v381_v4  ;;  %v523_v52 = vmul.f32 %v521_v24, %v515_v50  ;;  %v524_v44 = vmul.f32 %v521_v24, %v516_v25  ;;  %v546_v4 = vpop.permute.xlu0 %545 }
  0xff   :  { %v2143_v9 = vpop.permute.xlu1 %504  ;;  %v485_v29 = vrot.slane %v467_v19, 2  ;;  %v486_v40 = vrot.slane %v470_v62, 2  ;;  %v517_v27 = vrot.slane %v467_v19, 6  ;;  %v518_v41 = vrot.slane %v470_v62, 6 }
 0x100   :  { %v483_v34 = vrot.slane %v469_v32, 2  ;;  %v484_v20 = vrot.slane %v2163_v3, 2  ;;  %v477_v10 = vmul.f32 %v2137_v2, %v467_v19  ;;  %v478_v48 = vmul.f32 %v2137_v2, %v470_v62 }
 0x101   :  { %v479_v38 = vadd.f32 %v475_v0, %v406_v13  ;;  %v480_v28 = vadd.f32 %v476_v46, %v407_v36  ;;  %v499_v43 = vrot.slane %v469_v32, 4  ;;  %v500_v22 = vrot.slane %v2163_v3, 4 }
 0x102   :  { %v2210_v45 = vadd.f32 %v523_v52, %v454_v11  ;;  %v2212_v39 = vadd.f32 %v524_v44, %v455_v53  ;;  %v491_v49 = vmul.f32 %v2133_v54, %v483_v34  ;;  %v492_v7 = vmul.f32 %v2133_v54, %v484_v20 }
 0x103   :  { %v2169_v57 = vpop.permute.xlu1 %531  ;;  %v525_v33 = vmul.f32 %v521_v24, %v517_v27  ;;  %v526_v23 = vmul.f32 %v521_v24, %v518_v41  ;;  %v493_v26 = vmul.f32 %v2133_v54, %v485_v29  ;;  %v494_v2 = vmul.f32 %v2133_v54, %v486_v40 }
 0x104   :  { %v481_v47 = vadd.f32 %v477_v10, %v408_v5  ;;  %v482_v32 = vadd.f32 %v478_v48, %v409_v16  ;;  %v501_v15 = vrot.slane %v467_v19, 4  ;;  %v502_v3 = vrot.slane %v470_v62, 4  ;;  %v594_v19 = vpop.permute.xlu0 %593 }
 0x105   :  { %v507_v13 = vmul.f32 %v2143_v9, %v499_v43  ;;  %v508_v36 = vmul.f32 %v2143_v9, %v500_v22  ;;  %v495_v21 = vadd.f32 %v491_v49, %v2145_v14  ;;  %v496_v54 = vadd.f32 %v492_v7, %v2171_v6 }
 0x106   :  { %v509_v60 = vmul.f32 %v2143_v9, %v501_v15  ;;  %v510_v58 = vmul.f32 %v2143_v9, %v502_v3  ;;  %v529_v50 = vadd.f32 %v525_v33, %v456_v51  ;;  %v530_v25 = vadd.f32 %v526_v23, %v457_v1 }
 0x107   :  { %v534_v42 = vpop.permute.xlu1 %533  ;;  %v497_v5 = vadd.f32 %v493_v26, %v2173_v37  ;;  %v498_v16 = vadd.f32 %v494_v2, %v2147_v8  ;;  %v511_v1 = vadd.f32 %v507_v13, %v2184_v56  ;;  %v512_v37 = vadd.f32 %v508_v36, %v2187_v18 }
 0x108   :  { %v541_v12 = vsel %vm539_vm6, %v534_v42, %v536_v59  ;;  %v542_v24 = vsel %vm539_vm6, %v2169_v57, %v534_v42  ;;  %v513_v53 = vadd.f32 %v509_v60, %v2190_v63  ;;  %v514_v11 = vadd.f32 %v510_v58, %v2193_v31  ;;  %v609_v40 = vpop.permute.xlu0 %608 }
 0x109   :  { %v548_v62 = vmul.f32 %v546_v4, %v542_v24  ;;  %v549_v0 = vmul.f32 %v546_v4, %v541_v12  ;;  %v588_v9 = vrot.slane %v542_v24, 6  ;;  %v589_v51 = vrot.slane %v541_v12, 6 }
 0x10a   :  { %v556_v8 = vrot.slane %v542_v24, 2  ;;  %v557_v46 = vrot.slane %v541_v12, 2  ;;  %v572_v41 = vrot.slane %v542_v24, 4 }
 0x10b   :  { %v538_v30 = vpop.permute.xlu1 %537  ;;  %v2241_v27 = vadd.f32 %v548_v62, %v479_v38  ;;  %v596_v34 = vmul.f32 %v594_v19, %v588_v9  ;;  %v597_v18 = vmul.f32 %v594_v19, %v589_v51 }
 0x10c   :  { %v540_v14 = vsel %vm539_vm6, %v536_v59, %v538_v30  ;;  %v543_v6 = vsel %vm539_vm6, %v538_v30, %v2169_v57  ;;  %v2243_v57 = vadd.f32 %v549_v0, %v480_v28  ;;  %v573_v30 = vrot.slane %v541_v12, 4 }
 0x10d   :  { %v558_v52 = vrot.slane %v540_v14, 2  ;;  %v559_v44 = vrot.slane %v543_v6, 2  ;;  %v590_v59 = vrot.slane %v540_v14, 6  ;;  %v591_v29 = vrot.slane %v543_v6, 6 }
 0x10e   :  { %v550_v20 = vmul.f32 %v546_v4, %v540_v14  ;;  %v551_v10 = vmul.f32 %v546_v4, %v543_v6  ;;  %v574_v48 = vrot.slane %v540_v14, 4  ;;  %v575_v63 = vrot.slane %v543_v6, 4  ;;  %v619_v4 = vpop.permute.xlu0 %618 }
 0x10f   :  { %v562_v35 = vpop.permute.xlu1 %561  ;;  %v598_v22 = vmul.f32 %v594_v19, %v590_v59  ;;  %v599_v49 = vmul.f32 %v594_v19, %v591_v29  ;;  %v600_v15 = vadd.f32 %v596_v34, %v2210_v45  ;;  %v601_v3 = vadd.f32 %v597_v18, %v2212_v39 }
 0x110   :  { %v564_v43 = vmul.f32 %v562_v35, %v556_v8  ;;  %v565_v31 = vmul.f32 %v562_v35, %v557_v46  ;;  %v566_v7 = vmul.f32 %v562_v35, %v558_v52  ;;  %v567_v33 = vmul.f32 %v562_v35, %v559_v44 }
 0x111   :  { %v554_v13 = vadd.f32 %v550_v20, %v481_v47  ;;  %v555_v36 = vadd.f32 %v551_v10, %v482_v32  ;;  %v602_v58 = vadd.f32 %v598_v22, %v529_v50  ;;  %v603_v19 = vadd.f32 %v599_v49, %v530_v25 }
 0x112   :  { %v568_v60 = vadd.f32 %v564_v43, %v495_v21  ;;  %v569_v35 = vadd.f32 %v565_v31, %v496_v54  ;;  %v570_v62 = vadd.f32 %v566_v7, %v497_v5  ;;  %v571_v0 = vadd.f32 %v567_v33, %v498_v16 }
 0x114   :  { %v578_v42 = vpop.permute.xlu1 %577 }
 0x115   :  { %v580_v23 = vmul.f32 %v578_v42, %v572_v41  ;;  %v581_v38 = vmul.f32 %v578_v42, %v573_v30  ;;  %v582_v26 = vmul.f32 %v578_v42, %v574_v48  ;;  %v583_v28 = vmul.f32 %v578_v42, %v575_v63 }
 0x117   :  { %v584_v14 = vadd.f32 %v580_v23, %v511_v1  ;;  %v585_v6 = vadd.f32 %v581_v38, %v512_v37  ;;  %v586_v45 = vadd.f32 %v582_v26, %v513_v53  ;;  %v587_v42 = vadd.f32 %v583_v28, %v514_v11  ;;  %v667_v37 = vpop.permute.xlu0 %666 }
 0x118   :  { %v605_v56 = vpop.permute.xlu1 %604 }
 0x11c   :  { %v607_v2 = vpop.permute.xlu1 %606 }
 0x11d   :  { %v614_v12 = vsel %vm612_vm7, %v607_v2, %v609_v40  ;;  %v615_v24 = vsel %vm612_vm7, %v605_v56, %v607_v2 }
 0x11e   :  { %v661_v47 = vrot.slane %v615_v24, 6  ;;  %v662_v32 = vrot.slane %v614_v12, 6  ;;  %v621_v25 = vmul.f32 %v619_v4, %v615_v24  ;;  %v622_v5 = vmul.f32 %v619_v4, %v614_v12 }
 0x11f   :  { %v629_v16 = vrot.slane %v615_v24, 2  ;;  %v630_v1 = vrot.slane %v614_v12, 2  ;;  %v645_v46 = vrot.slane %v615_v24, 4  ;;  %v646_v53 = vrot.slane %v614_v12, 4 }
 0x120   :  { %v611_v39 = vpop.permute.xlu1 %610  ;;  %v669_v30 = vmul.f32 %v667_v37, %v661_v47  ;;  %v625_v43 = vadd.f32 %v621_v25, %v2241_v27  ;;  %v626_v31 = vadd.f32 %v622_v5, %v2243_v57  ;;  %v29_v57 = vld [vmem:[%s2690_s5] sm:$0xf]  ;;  %s1568_s5 = smov 69  }
 0x121   :  { %v613_v9 = vsel %vm612_vm7, %v609_v40, %v611_v39  ;;  %v616_v51 = vsel %vm612_vm7, %v611_v39, %v605_v56  ;;  %v670_v56 = vmul.f32 %v667_v37, %v662_v32 }
 0x122   :  { %v623_v8 = vmul.f32 %v619_v4, %v613_v9  ;;  %v624_v21 = vmul.f32 %v619_v4, %v616_v51  ;;  %v631_v54 = vrot.slane %v613_v9, 2  ;;  %v632_v50 = vrot.slane %v616_v51, 2 }
 0x123   :  { %v663_v11 = vrot.slane %v613_v9, 6  ;;  %v664_v52 = vrot.slane %v616_v51, 6  ;;  %v647_v22 = vrot.slane %v613_v9, 4  ;;  %v648_v49 = vrot.slane %v616_v51, 4 }
 0x124   :  { %v635_v44 = vpop.permute.xlu1 %634  ;;  %v627_v34 = vadd.f32 %v623_v8, %v554_v13  ;;  %v628_v18 = vadd.f32 %v624_v21, %v555_v36  ;;  %v673_v36 = vadd.f32 %v669_v30, %v600_v15  ;;  %v674_v12 = vadd.f32 %v670_v56, %v601_v3 }
 0x125   :  { %v637_v59 = vmul.f32 %v635_v44, %v629_v16  ;;  %v638_v29 = vmul.f32 %v635_v44, %v630_v1  ;;  %v639_v40 = vmul.f32 %v635_v44, %v631_v54  ;;  %v640_v41 = vmul.f32 %v635_v44, %v632_v50 }
 0x126   :  { %v671_v20 = vmul.f32 %v667_v37, %v663_v11  ;;  %v672_v10 = vmul.f32 %v667_v37, %v664_v52  ;;  %v703_v15 = vrot.slane %v29_v57, %v702_v17  ;;  %v2756_v3 = vsub.s32 1, %v1981_v61  ;;  %v2281_v11 = vld [vmem:[%s2691_s3] sm:$0xff]  ;;  %s1570_s3 = smov 63  }
 0x127   :  { %v643_v48 = vadd.f32 %v639_v40, %v570_v62  ;;  %v644_v63 = vadd.f32 %v640_v41, %v571_v0  ;;  %v641_v7 = vadd.f32 %v637_v59, %v568_v60  ;;  %v642_v33 = vadd.f32 %v638_v29, %v569_v35 }
 0x128   :  { %v675_v24 = vadd.f32 %v671_v20, %v602_v58  ;;  %v676_v62 = vadd.f32 %v672_v10, %v603_v19  ;;  %v707_v58 = vrot.slane %v29_v57, %v2756_v3  ;;  %v710_v19 = vsub.s32 2, %v1981_v61 }
 0x129   :  { %v651_v23 = vpop.permute.xlu1 %650  ;;  %v679_v38 = vadd.f32 %v643_v48, %v627_v34  ;;  %v680_v26 = vadd.f32 %v644_v63, %v628_v18  ;;  %v677_v60 = vadd.f32 %v641_v7, %v625_v43  ;;  %v678_v35 = vadd.f32 %v642_v33, %v626_v31 }
 0x12a   :  { %v653_v28 = vmul.f32 %v651_v23, %v645_v46  ;;  %v654_v2 = vmul.f32 %v651_v23, %v646_v53  ;;  %v655_v4 = vmul.f32 %v651_v23, %v647_v22  ;;  %v656_v13 = vmul.f32 %v651_v23, %v648_v49 }
 0x12b   :  { %v711_v5 = vrot.slane %v29_v57, %v710_v19  ;;  %v2757_v52 = vmov 2   ;;  %v2758_v44 = vmov 4   ;;  %v2759_v59 = vmov 3  }
 0x12c   :  { %v657_v0 = vadd.f32 %v653_v28, %v584_v14  ;;  %v658_v39 = vadd.f32 %v654_v2, %v585_v6  ;;  %v659_v27 = vadd.f32 %v655_v4, %v586_v45  ;;  %v660_v47 = vadd.f32 %v656_v13, %v587_v42 }
 0x12d   :  { %v714_v14 = vsub.s32 3, %v1981_v61  ;;  %v2760_v29 = vmov 5   ;;  %v2761_v40 = vmov 7   ;;  %v2762_v41 = vmov 8  }
 0x12e   :  { %v681_v32 = vadd.f32 %v673_v36, %v657_v0  ;;  %v682_v9 = vadd.f32 %v674_v12, %v658_v39  ;;  %v683_v51 = vadd.f32 %v675_v24, %v659_v27  ;;  %v684_v8 = vadd.f32 %v676_v62, %v660_v47  ;;  %v693_v6 = vpop.permute.xlu1 %692  ;;  %v1381_v12 = vld [vmem:[%s2692_s4] sm:$0xff] }
 0x12f   :  { %v715_v16 = vrot.slane %v29_v57, %v714_v14  ;;  %v2763_v30 = vmov 6   ;;  %v2764_v56 = vmov 11   ;;  %v2765_v34 = vmov 9  }
 0x130   :  { %v685_v45 = vadd.f32 %v681_v32, %v677_v60  ;;  %v686_v42 = vadd.f32 %v682_v9, %v678_v35  ;;  %v687_v21 = vadd.f32 %v683_v51, %v679_v38  ;;  %v688_v54 = vadd.f32 %v684_v8, %v680_v26 }
 0x131   :  { %v2766_v18 = vmov 12   ;;  %v2767_v20 = vmov 15   ;;  %v2768_v10 = vmov 18   ;;  %v2769_v48 = vmov 10  }
 0x132   :  { %v695_v50 = vadd.f32 %v693_v6, %v685_v45  ;;  %v696_v25 = vadd.f32 %v693_v6, %v686_v42  ;;  %v697_v1 = vadd.f32 %v693_v6, %v687_v21  ;;  %v698_v37 = vadd.f32 %v693_v6, %v688_v54 }
 0x133   :  { %v2770_v63 = vmov 21   ;;  %v2771_v43 = vmov 13   ;;  %v2772_v31 = vmov 24   ;;  %v2773_v22 = vmov 14  }
 0x134   :  { %v2266_v46 = vmul.f32 %v703_v15, %v695_v50  ;;  %v2268_v17 = vmul.f32 %v707_v58, %v696_v25  ;;  %v2272_v61 = vmul.f32 %v711_v5, %v697_v1  ;;  %v2274_v53 = vmul.f32 %v715_v16, %v698_v37 }
 0x135   :  { %v2774_v49 = vmov 27   ;;  %v2775_v7 = vmov 16   ;;  %v2776_v33 = vmov 28   ;;  %v2777_v23 = vmov 17  }
 0x136   :  { %726 = vrot.lane.b32.xlu0 %v2268_v17, %s1568_s5  ;;  %724 = vrot.lane.b32.xlu1 %v2266_v46, %s1568_s5  ;;  %v2778_v38 = vmov 31   ;;  %v2779_v26 = vmov 19   ;;  %v2780_v28 = vmov 32   ;;  %v2781_v2 = vmov 20  }
 0x137   :  { %v2782_v4 = vmov 35   ;;  %v2783_v13 = vmov 22   ;;  %v2784_v36 = vmov 0   ;;  %v2785_v24 = vmov 23  }
 0x138   :  { %v2786_v47 = vmov 25   ;;  %v2787_v9 = vmov 26   ;;  %v2788_v51 = vmov 29  }
 0x13a   :  { %730 = vrot.lane.b32.xlu0 %v2274_v53, %s1568_s5  ;;  %728 = vrot.lane.b32.xlu1 %v2272_v61, %s1568_s5 }
 0x13e   :  { %755 = vperm.xlu0 %1488, %v2281_v11   ;;  %739 = vperm.xlu1 %1487, %v2281_v11  }
 0x142   :  { %798 = vrot.lane.b32.xlu0 %v2266_v46, %s1569_s18  ;;  %1489 = vset.pattern.permute.xlu1 %v2757_v52 }
 0x143   :  { %771 = vperm.xlu1 %1489, %v2281_v11   ;;  %1491 = vset.pattern.permute.xlu0 %v2758_v44 }
 0x146   :  { %802 = vrot.lane.b32.xlu0 %v2272_v61, %s1569_s18 }
 0x147   :  { %1490 = vset.pattern.permute.xlu1 %v2759_v59 }
 0x148   :  { %787 = vperm.xlu1 %1490, %v2281_v11  }
 0x14a   :  { %812 = vperm.xlu0 %1491, %v2281_v11  }
 0x14c   :  { %800 = vrot.lane.b32.xlu1 %v2268_v17, %s1569_s18 }
 0x14d   :  { %1492 = vset.pattern.permute.xlu1 %v2760_v29 }
 0x14e   :  { %1494 = vset.pattern.permute.xlu0 %v2761_v40 }
 0x14f   :  { %860 = vperm.xlu0 %1494, %v2281_v11  }
 0x150   :  { %804 = vrot.lane.b32.xlu1 %v2274_v53, %s1569_s18 }
 0x153   :  { %875 = vrot.lane.b32.xlu0 %v2272_v61, %s1570_s3 }
 0x154   :  { %828 = vperm.xlu1 %1492, %v2281_v11   ;;  %1495 = vset.pattern.permute.xlu0 %v2762_v41 }
 0x157   :  { %885 = vperm.xlu0 %1495, %v2281_v11  }
 0x158   :  { %1493 = vset.pattern.permute.xlu1 %v2763_v30 }
 0x159   :  { %844 = vperm.xlu1 %1493, %v2281_v11  }
 0x15b   :  { %1498 = vset.pattern.permute.xlu0 %v2764_v56 }
 0x15c   :  { %933 = vperm.xlu0 %1498, %v2281_v11  }
 0x15d   :  { %871 = vrot.lane.b32.xlu1 %v2266_v46, %s1570_s3 }
 0x15e   :  { %1496 = vset.pattern.permute.xlu1 %v2765_v34 }
 0x160   :  { %948 = vrot.lane.b32.xlu0 %v2272_v61, %s1571_s19 }
 0x161   :  { %873 = vrot.lane.b32.xlu1 %v2268_v17, %s1570_s3  ;;  %1499 = vset.pattern.permute.xlu0 %v2766_v18 }
 0x164   :  { %958 = vperm.xlu0 %1499, %v2281_v11  }
 0x165   :  { %877 = vrot.lane.b32.xlu1 %v2274_v53, %s1570_s3 }
 0x168   :  { %1502 = vset.pattern.permute.xlu0 %v2767_v20 }
 0x169   :  { %1006 = vperm.xlu0 %1502, %v2281_v11   ;;  %901 = vperm.xlu1 %1496, %v2281_v11  }
 0x16d   :  { %1505 = vset.pattern.permute.xlu0 %v2768_v10  ;;  %1497 = vset.pattern.permute.xlu1 %v2769_v48 }
 0x16e   :  { %1050 = vperm.xlu0 %1505, %v2281_v11   ;;  %917 = vperm.xlu1 %1497, %v2281_v11  }
 0x172   :  { %1079 = vrot.lane.b32.xlu0 %v2268_v17, %s1572_s20  ;;  %944 = vrot.lane.b32.xlu1 %v2266_v46, %s1571_s19 }
 0x173   :  { %1508 = vset.pattern.permute.xlu0 %v2770_v63  ;;  %1500 = vset.pattern.permute.xlu1 %v2771_v43 }
 0x176   :  { %1083 = vrot.lane.b32.xlu0 %v2274_v53, %s1572_s20  ;;  %946 = vrot.lane.b32.xlu1 %v2268_v17, %s1571_s19 }
 0x17a   :  { %1107 = vperm.xlu0 %1508, %v2281_v11   ;;  %950 = vrot.lane.b32.xlu1 %v2274_v53, %s1571_s19 }
 0x17e   :  { %1511 = vset.pattern.permute.xlu0 %v2772_v31  ;;  %974 = vperm.xlu1 %1500, %v2281_v11  }
 0x17f   :  { %1164 = vperm.xlu0 %1511, %v2281_v11  }
 0x182   :  { %1501 = vset.pattern.permute.xlu1 %v2773_v22 }
 0x183   :  { %1514 = vset.pattern.permute.xlu0 %v2774_v49  ;;  %990 = vperm.xlu1 %1501, %v2281_v11  }
 0x184   :  { %1212 = vperm.xlu0 %1514, %v2281_v11  }
 0x187   :  { %1503 = vset.pattern.permute.xlu1 %v2775_v7  ;;  %v2789_v7 = vmov 30  }
 0x188   :  { %1154 = vrot.lane.b32.xlu0 %v2272_v61, %s1573_s21  ;;  %1018 = vperm.xlu1 %1503, %v2281_v11  }
 0x189   :  { %1515 = vset.pattern.permute.xlu0 %v2776_v33 }
 0x18c   :  { %1237 = vperm.xlu0 %1515, %v2281_v11   ;;  %1504 = vset.pattern.permute.xlu1 %v2777_v23 }
 0x18d   :  { %1034 = vperm.xlu1 %1504, %v2281_v11  }
 0x190   :  { %1518 = vset.pattern.permute.xlu0 %v2778_v38 }
 0x191   :  { %1285 = vperm.xlu0 %1518, %v2281_v11   ;;  %1506 = vset.pattern.permute.xlu1 %v2779_v26 }
 0x192   :  { %1066 = vperm.xlu1 %1506, %v2281_v11  }
 0x195   :  { %1227 = vrot.lane.b32.xlu0 %v2272_v61, %s1574_s22 }
 0x196   :  { %1077 = vrot.lane.b32.xlu1 %v2266_v46, %s1572_s20  ;;  %1519 = vset.pattern.permute.xlu0 %v2780_v28 }
 0x197   :  { %1507 = vset.pattern.permute.xlu1 %v2781_v2 }
 0x199   :  { %1310 = vperm.xlu0 %1519, %v2281_v11  }
 0x19a   :  { %1081 = vrot.lane.b32.xlu1 %v2272_v61, %s1572_s20 }
 0x19d   :  { %1522 = vset.pattern.permute.xlu0 %v2782_v4 }
 0x19e   :  { %1358 = vperm.xlu0 %1522, %v2281_v11   ;;  %1091 = vperm.xlu1 %1507, %v2281_v11  }
 0x1a2   :  { %1300 = vrot.lane.b32.xlu0 %v2272_v61, %s1575_s23  ;;  %1509 = vset.pattern.permute.xlu1 %v2783_v13 }
 0x1a3   :  { %1123 = vperm.xlu1 %1509, %v2281_v11   ;;  %1523 = vset.pattern.permute.xlu0 %v2784_v36 }
 0x1a6   :  { %1384 = vperm.xlu0 %1523, %v1381_v12  }
 0x1a7   :  { %1510 = vset.pattern.permute.xlu1 %v2785_v24 }
 0x1a8   :  { %v727_v62 = vpop.permute.xlu0 %726  ;;  %1139 = vperm.xlu1 %1510, %v2281_v11   ;;  %v725_v0 = vpop.permute.xlu1 %724 }
 0x1a9   :  { %v735_v39 = vsel %vm732_vm8, %v725_v0, %v727_v62 }
 0x1aa   :  { %v751_v8 = vrot.slane %v735_v39, 2  ;;  %v767_v16 = vrot.slane %v735_v39, 4  ;;  %v783_v34 = vrot.slane %v735_v39, 6 }
 0x1ac   :  { %v731_v27 = vpop.permute.xlu0 %730  ;;  %1512 = vset.pattern.permute.xlu1 %v2786_v47  ;;  %v729_v57 = vpop.permute.xlu1 %728  ;;  %v2790_v47 = vmov 33  }
 0x1ad   :  { %v736_v60 = vsel %vm732_vm8, %v731_v27, %v725_v0  ;;  %v733_v35 = vsel %vm732_vm8, %v729_v57, %v731_v27  ;;  %v734_v32 = vsel %vm732_vm8, %v727_v62, %v729_v57  ;;  %1180 = vperm.xlu1 %1512, %v2281_v11  }
 0x1ae   :  { %v750_v15 = vrot.slane %v736_v60, 2  ;;  %v752_v3 = vrot.slane %v734_v32, 2  ;;  %v753_v58 = vrot.slane %v733_v35, 2  ;;  %v766_v1 = vrot.slane %v736_v60, 4 }
 0x1af   :  { %v768_v37 = vrot.slane %v734_v32, 4  ;;  %v769_v52 = vrot.slane %v733_v35, 4  ;;  %v782_v18 = vrot.slane %v736_v60, 6  ;;  %v784_v20 = vrot.slane %v734_v32, 6 }
 0x1b0   :  { %v785_v10 = vrot.slane %v733_v35, 6 }
 0x1b1   :  { %1513 = vset.pattern.permute.xlu1 %v2787_v9 }
 0x1b2   :  { %1196 = vperm.xlu1 %1513, %v2281_v11  }
 0x1b6   :  { %1150 = vrot.lane.b32.xlu1 %v2266_v46, %s1573_s21 }
 0x1b7   :  { %1516 = vset.pattern.permute.xlu1 %v2788_v51 }
 0x1b9   :  { %v756_v19 = vpop.permute.xlu0 %755  ;;  %v740_v14 = vpop.permute.xlu1 %739 }
 0x1ba   :  { %v2379_v6 = vmul.f32 %v756_v19, %v750_v15  ;;  %v2381_v45 = vmul.f32 %v756_v19, %v751_v8  ;;  %v2383_v42 = vmul.f32 %v756_v19, %v752_v3  ;;  %v2385_v21 = vmul.f32 %v756_v19, %v753_v58  ;;  %1152 = vrot.lane.b32.xlu1 %v2268_v17, %s1573_s21 }
 0x1bb   :  { %v742_v54 = vmul.f32 %v740_v14, %v736_v60  ;;  %v743_v50 = vmul.f32 %v740_v14, %v735_v39  ;;  %v744_v25 = vmul.f32 %v740_v14, %v734_v32  ;;  %v745_v5 = vmul.f32 %v740_v14, %v733_v35 }
 0x1bd   :  { %v799_v44 = vpop.permute.xlu0 %798 }
 0x1be   :  { %1156 = vrot.lane.b32.xlu1 %v2274_v53, %s1573_s21  ;;  %v772_v59 = vpop.permute.xlu1 %771 }
 0x1bf   :  { %v2391_v29 = vmul.f32 %v772_v59, %v766_v1  ;;  %v2393_v40 = vmul.f32 %v772_v59, %v767_v16  ;;  %v2395_v41 = vmul.f32 %v772_v59, %v768_v37  ;;  %v2397_v30 = vmul.f32 %v772_v59, %v769_v52 }
 0x1c1   :  { %v803_v56 = vpop.permute.xlu0 %802 }
 0x1c2   :  { %1253 = vperm.xlu1 %1516, %v2281_v11  }
 0x1c3   :  { %v788_v48 = vpop.permute.xlu1 %787 }
 0x1c4   :  { %v790_v63 = vmul.f32 %v788_v48, %v782_v18  ;;  %v791_v43 = vmul.f32 %v788_v48, %v783_v34  ;;  %v792_v31 = vmul.f32 %v788_v48, %v784_v20  ;;  %v793_v22 = vmul.f32 %v788_v48, %v785_v10 }
 0x1c5   :  { %v813_v49 = vpop.permute.xlu0 %812 }
 0x1c6   :  { %1517 = vset.pattern.permute.xlu1 %v2789_v7 }
 0x1c7   :  { %1269 = vperm.xlu1 %1517, %v2281_v11   ;;  %v801_v33 = vpop.permute.xlu1 %800 }
 0x1c8   :  { %v808_v23 = vsel %vm806_vm9, %v801_v33, %v803_v56  ;;  %v809_v38 = vsel %vm806_vm9, %v799_v44, %v801_v33 }
 0x1c9   :  { %v816_v26 = vmul.f32 %v813_v49, %v809_v38  ;;  %v817_v28 = vmul.f32 %v813_v49, %v808_v23  ;;  %v856_v2 = vrot.slane %v809_v38, 6  ;;  %v857_v4 = vrot.slane %v808_v23, 6 }
 0x1ca   :  { %v861_v13 = vpop.permute.xlu0 %860  ;;  %v824_v9 = vrot.slane %v809_v38, 2  ;;  %v825_v51 = vrot.slane %v808_v23, 2  ;;  %v840_v52 = vrot.slane %v809_v38, 4 }
 0x1cb   :  { %v2407_v36 = vadd.f32 %v816_v26, %v743_v50  ;;  %v2409_v12 = vadd.f32 %v817_v28, %v744_v25  ;;  %1223 = vrot.lane.b32.xlu1 %v2266_v46, %s1574_s22  ;;  %v805_v24 = vpop.permute.xlu1 %804  ;;  %v864_v62 = vmul.f32 %v861_v13, %v856_v2  ;;  %v865_v0 = vmul.f32 %v861_v13, %v857_v4 }
 0x1cc   :  { %v807_v39 = vsel %vm806_vm9, %v803_v56, %v805_v24  ;;  %v810_v27 = vsel %vm806_vm9, %v805_v24, %v799_v44  ;;  %1520 = vset.pattern.permute.xlu1 %v2790_v47  ;;  %v841_v44 = vrot.slane %v808_v23, 4  ;;  %v2791_v26 = vmov 34  }
 0x1cd   :  { %v815_v57 = vmul.f32 %v813_v49, %v810_v27  ;;  %v818_v60 = vmul.f32 %v813_v49, %v807_v39  ;;  %v823_v35 = vrot.slane %v810_v27, 2  ;;  %v826_v32 = vrot.slane %v807_v39, 2 }
 0x1ce   :  { %v2418_v8 = vadd.f32 %v864_v62, %v791_v43  ;;  %v2420_v15 = vadd.f32 %v865_v0, %v792_v31  ;;  %v855_v19 = vrot.slane %v810_v27, 6  ;;  %v858_v14 = vrot.slane %v807_v39, 6  ;;  %v876_v31 = vpop.permute.xlu0 %875 }
 0x1cf   :  { %v2422_v3 = vadd.f32 %v815_v57, %v742_v54  ;;  %v2424_v58 = vadd.f32 %v818_v60, %v745_v5  ;;  %1225 = vrot.lane.b32.xlu1 %v2268_v17, %s1574_s22  ;;  %v829_v50 = vpop.permute.xlu1 %828  ;;  %v839_v20 = vrot.slane %v810_v27, 4  ;;  %v842_v10 = vrot.slane %v807_v39, 4 }
 0x1d0   :  { %v831_v25 = vmul.f32 %v829_v50, %v823_v35  ;;  %v832_v16 = vmul.f32 %v829_v50, %v824_v9  ;;  %v833_v1 = vmul.f32 %v829_v50, %v825_v51  ;;  %v834_v37 = vmul.f32 %v829_v50, %v826_v32 }
 0x1d1   :  { %v863_v59 = vmul.f32 %v861_v13, %v855_v19  ;;  %v866_v56 = vmul.f32 %v861_v13, %v858_v14 }
 0x1d2   :  { %v835_v34 = vadd.f32 %v831_v25, %v2379_v6  ;;  %v836_v54 = vadd.f32 %v832_v16, %v2381_v45  ;;  %v837_v5 = vadd.f32 %v833_v1, %v2383_v42  ;;  %v838_v18 = vadd.f32 %v834_v37, %v2385_v21 }
 0x1d3   :  { %v867_v48 = vadd.f32 %v863_v59, %v790_v63  ;;  %v870_v43 = vadd.f32 %v866_v56, %v793_v22  ;;  %1229 = vrot.lane.b32.xlu1 %v2274_v53, %s1574_s22  ;;  %v886_v22 = vpop.permute.xlu0 %885 }
 0x1d4   :  { %v845_v49 = vpop.permute.xlu1 %844 }
 0x1d5   :  { %v847_v7 = vmul.f32 %v845_v49, %v839_v20  ;;  %v848_v33 = vmul.f32 %v845_v49, %v840_v52  ;;  %v849_v23 = vmul.f32 %v845_v49, %v841_v44  ;;  %v850_v38 = vmul.f32 %v845_v49, %v842_v10 }
 0x1d7   :  { %v2435_v6 = vadd.f32 %v847_v7, %v2391_v29  ;;  %v2438_v45 = vadd.f32 %v848_v33, %v2393_v40  ;;  %v2441_v42 = vadd.f32 %v849_v23, %v2395_v41  ;;  %v2444_v21 = vadd.f32 %v850_v38, %v2397_v30  ;;  %1326 = vperm.xlu1 %1520, %v2281_v11   ;;  %v934_v13 = vpop.permute.xlu0 %933 }
 0x1d8   :  { %v872_v63 = vpop.permute.xlu1 %871 }
 0x1db   :  { %1521 = vset.pattern.permute.xlu1 %v2791_v26  ;;  %v949_v38 = vpop.permute.xlu0 %948 }
 0x1dc   :  { %1342 = vperm.xlu1 %1521, %v2281_v11   ;;  %v874_v29 = vpop.permute.xlu1 %873 }
 0x1dd   :  { %v881_v40 = vsel %vm879_vm10, %v874_v29, %v876_v31  ;;  %v882_v41 = vsel %vm879_vm10, %v872_v63, %v874_v29 }
 0x1de   :  { %v889_v28 = vmul.f32 %v886_v22, %v882_v41  ;;  %v890_v30 = vmul.f32 %v886_v22, %v881_v40  ;;  %v929_v2 = vrot.slane %v882_v41, 6  ;;  %v930_v4 = vrot.slane %v881_v40, 6 }
 0x1df   :  { %v897_v9 = vrot.slane %v882_v41, 2  ;;  %v914_v49 = vrot.slane %v881_v40, 4  ;;  %v959_v29 = vpop.permute.xlu0 %958 }
 0x1e0   :  { %v893_v24 = vadd.f32 %v889_v28, %v2407_v36  ;;  %v894_v62 = vadd.f32 %v890_v30, %v2409_v12  ;;  %1296 = vrot.lane.b32.xlu1 %v2266_v46, %s1575_s23  ;;  %v878_v11 = vpop.permute.xlu1 %877  ;;  %v937_v0 = vmul.f32 %v934_v13, %v929_v2  ;;  %v938_v39 = vmul.f32 %v934_v13, %v930_v4 }
 0x1e1   :  { %v880_v27 = vsel %vm879_vm10, %v876_v31, %v878_v11  ;;  %v883_v47 = vsel %vm879_vm10, %v878_v11, %v872_v63  ;;  %v898_v36 = vrot.slane %v881_v40, 2  ;;  %v913_v31 = vrot.slane %v882_v41, 4 }
 0x1e2   :  { %v888_v57 = vmul.f32 %v886_v22, %v883_v47  ;;  %v891_v60 = vmul.f32 %v886_v22, %v880_v27  ;;  %v896_v35 = vrot.slane %v883_v47, 2  ;;  %v899_v32 = vrot.slane %v880_v27, 2 }
 0x1e3   :  { %v2463_v12 = vadd.f32 %v937_v0, %v2418_v8  ;;  %v2466_v51 = vadd.f32 %v938_v39, %v2420_v15  ;;  %v928_v50 = vrot.slane %v883_v47, 6  ;;  %v931_v25 = vrot.slane %v880_v27, 6 }
 0x1e4   :  { %v892_v19 = vadd.f32 %v888_v57, %v2422_v3  ;;  %v895_v14 = vadd.f32 %v891_v60, %v2424_v58  ;;  %1298 = vrot.lane.b32.xlu1 %v2268_v17, %s1575_s23  ;;  %v902_v16 = vpop.permute.xlu1 %901  ;;  %v912_v7 = vrot.slane %v883_v47, 4  ;;  %v915_v33 = vrot.slane %v880_v27, 4  ;;  %v1007_v11 = vpop.permute.xlu0 %1006 }
 0x1e5   :  { %v904_v1 = vmul.f32 %v902_v16, %v896_v35  ;;  %v905_v37 = vmul.f32 %v902_v16, %v897_v9  ;;  %v906_v52 = vmul.f32 %v902_v16, %v898_v36  ;;  %v907_v44 = vmul.f32 %v902_v16, %v899_v32 }
 0x1e6   :  { %v936_v59 = vmul.f32 %v934_v13, %v928_v50  ;;  %v939_v8 = vmul.f32 %v934_v13, %v931_v25 }
 0x1e7   :  { %v908_v56 = vadd.f32 %v904_v1, %v835_v34  ;;  %v909_v20 = vadd.f32 %v905_v37, %v836_v54  ;;  %v2472_v15 = vadd.f32 %v906_v52, %v837_v5  ;;  %v2474_v10 = vadd.f32 %v907_v44, %v838_v18 }
 0x1e8   :  { %v940_v3 = vadd.f32 %v936_v59, %v867_v48  ;;  %v943_v58 = vadd.f32 %v939_v8, %v870_v43  ;;  %1302 = vrot.lane.b32.xlu1 %v2274_v53, %s1575_s23 }
 0x1e9   :  { %v918_v23 = vpop.permute.xlu1 %917 }
 0x1ea   :  { %v920_v63 = vmul.f32 %v918_v23, %v912_v7  ;;  %v921_v22 = vmul.f32 %v918_v23, %v913_v31  ;;  %v922_v26 = vmul.f32 %v918_v23, %v914_v49  ;;  %v923_v34 = vmul.f32 %v918_v23, %v915_v33 }
 0x1ec   :  { %v924_v54 = vadd.f32 %v920_v63, %v2435_v6  ;;  %v925_v5 = vadd.f32 %v921_v22, %v2438_v45  ;;  %v926_v18 = vadd.f32 %v922_v26, %v2441_v42  ;;  %v927_v48 = vadd.f32 %v923_v34, %v2444_v21 }
 0x1ed   :  { %v945_v43 = vpop.permute.xlu1 %944 }
 0x1f1   :  { %v947_v40 = vpop.permute.xlu1 %946 }
 0x1f2   :  { %v954_v41 = vsel %vm952_vm11, %v947_v40, %v949_v38  ;;  %v955_v28 = vsel %vm952_vm11, %v945_v43, %v947_v40 }
 0x1f3   :  { %v962_v30 = vmul.f32 %v959_v29, %v955_v28  ;;  %v963_v2 = vmul.f32 %v959_v29, %v954_v41  ;;  %v1002_v4 = vrot.slane %v955_v28, 6  ;;  %v1003_v13 = vrot.slane %v954_v41, 6 }
 0x1f4   :  { %v970_v32 = vrot.slane %v955_v28, 2  ;;  %v971_v9 = vrot.slane %v954_v41, 2  ;;  %v986_v8 = vrot.slane %v955_v28, 4  ;;  %v987_v31 = vrot.slane %v954_v41, 4 }
 0x1f5   :  { %v966_v0 = vadd.f32 %v962_v30, %v893_v24  ;;  %v967_v6 = vadd.f32 %v963_v2, %v894_v62  ;;  %v951_v39 = vpop.permute.xlu1 %950  ;;  %v1010_v45 = vmul.f32 %v1007_v11, %v1002_v4  ;;  %v1011_v27 = vmul.f32 %v1007_v11, %v1003_v13 }
 0x1f6   :  { %v953_v42 = vsel %vm952_vm11, %v949_v38, %v951_v39  ;;  %v956_v47 = vsel %vm952_vm11, %v951_v39, %v945_v43  ;;  %v1031_v4 = vrot.slane %v2272_v61, 2  ;;  %v1032_v13 = vrot.slane %v2274_v53, 2 }
 0x1f7   :  { %v961_v21 = vmul.f32 %v959_v29, %v956_v47  ;;  %v964_v57 = vmul.f32 %v959_v29, %v953_v42  ;;  %v969_v60 = vrot.slane %v956_v47, 2  ;;  %v972_v35 = vrot.slane %v953_v42, 2 }
 0x1f8   :  { %v1001_v36 = vrot.slane %v956_v47, 6  ;;  %v1004_v50 = vrot.slane %v953_v42, 6  ;;  %v2484_v37 = vadd.f32 %v1010_v45, %v2463_v12  ;;  %v2487_v24 = vadd.f32 %v1011_v27, %v2466_v51 }
 0x1f9   :  { %v965_v25 = vadd.f32 %v961_v21, %v892_v19  ;;  %v968_v16 = vadd.f32 %v964_v57, %v895_v14  ;;  %v975_v1 = vpop.permute.xlu1 %974  ;;  %v985_v14 = vrot.slane %v956_v47, 4  ;;  %v988_v63 = vrot.slane %v953_v42, 4 }
 0x1fa   :  { %v1009_v62 = vmul.f32 %v1007_v11, %v1001_v36  ;;  %v1012_v52 = vmul.f32 %v1007_v11, %v1004_v50  ;;  %v977_v44 = vmul.f32 %v975_v1, %v969_v60  ;;  %v978_v59 = vmul.f32 %v975_v1, %v970_v32 }
 0x1fb   :  { %v979_v49 = vmul.f32 %v975_v1, %v971_v9  ;;  %v980_v7 = vmul.f32 %v975_v1, %v972_v35  ;;  %v1029_v11 = vrot.slane %v2266_v46, 2  ;;  %v1062_v35 = vrot.slane %v2268_v17, 6 }
 0x1fc   :  { %v981_v33 = vadd.f32 %v977_v44, %v908_v56  ;;  %v982_v23 = vadd.f32 %v978_v59, %v909_v20  ;;  %v1013_v38 = vadd.f32 %v1009_v62, %v940_v3  ;;  %v1016_v19 = vadd.f32 %v1012_v52, %v943_v58  ;;  %v2499_v3 = vpop.permute.xlu0 %1050 }
 0x1fd   :  { %v983_v12 = vadd.f32 %v979_v49, %v2472_v15  ;;  %v984_v22 = vadd.f32 %v980_v7, %v2474_v10  ;;  %v1063_v32 = vrot.slane %v2272_v61, 6  ;;  %v1064_v9 = vrot.slane %v2274_v53, 6 }
 0x1fe   :  { %v991_v51 = vpop.permute.xlu1 %990  ;;  %v1061_v36 = vrot.slane %v2266_v46, 6 }
 0x1ff   :  { %v993_v26 = vmul.f32 %v991_v51, %v985_v14  ;;  %v994_v34 = vmul.f32 %v991_v51, %v986_v8  ;;  %v995_v43 = vmul.f32 %v991_v51, %v987_v31  ;;  %v996_v29 = vmul.f32 %v991_v51, %v988_v63 }
 0x200   :  { %v1080_v21 = vpop.permute.xlu0 %1079 }
 0x201   :  { %v2491_v40 = vadd.f32 %v993_v26, %v924_v54  ;;  %v2493_v41 = vadd.f32 %v994_v34, %v925_v5  ;;  %v2495_v28 = vadd.f32 %v995_v43, %v926_v18  ;;  %v2497_v56 = vadd.f32 %v996_v29, %v927_v48 }
 0x202   :  { %v1030_v48 = vrot.slane %v2268_v17, 2 }
 0x203   :  { %v1019_v20 = vpop.permute.xlu1 %1018 }
 0x204   :  { %v1021_v15 = vmul.f32 %v1019_v20, %v2266_v46  ;;  %v1022_v10 = vmul.f32 %v1019_v20, %v2268_v17  ;;  %v1023_v58 = vmul.f32 %v1019_v20, %v2272_v61  ;;  %v1024_v30 = vmul.f32 %v1019_v20, %v2274_v53  ;;  %v1084_v52 = vpop.permute.xlu0 %1083 }
 0x205   :  { %v1047_v20 = vrot.slane %v2272_v61, 4 }
 0x206   :  { %v2505_v2 = vadd.f32 %v1021_v15, %v965_v25  ;;  %v2507_v54 = vadd.f32 %v1022_v10, %v966_v0  ;;  %v2509_v5 = vadd.f32 %v1023_v58, %v967_v6  ;;  %v2511_v18 = vadd.f32 %v1024_v30, %v968_v16 }
 0x207   :  { %v1048_v15 = vrot.slane %v2274_v53, 4 }
 0x208   :  { %v1035_v39 = vpop.permute.xlu1 %1034  ;;  %v1108_v63 = vpop.permute.xlu0 %1107 }
 0x209   :  { %v1037_v45 = vmul.f32 %v1035_v39, %v1029_v11  ;;  %v1038_v27 = vmul.f32 %v1035_v39, %v1030_v48  ;;  %v1039_v42 = vmul.f32 %v1035_v39, %v1031_v4  ;;  %v1040_v47 = vmul.f32 %v1035_v39, %v1032_v13 }
 0x20a   :  { %v1055_v39 = vmul.f32 %v2499_v3, %v1047_v20 }
 0x20b   :  { %v1041_v0 = vadd.f32 %v1037_v45, %v981_v33  ;;  %v1042_v57 = vadd.f32 %v1038_v27, %v982_v23  ;;  %v1043_v6 = vadd.f32 %v1039_v42, %v983_v12  ;;  %v1044_v60 = vadd.f32 %v1040_v47, %v984_v22 }
 0x20c   :  { %v1056_v45 = vmul.f32 %v2499_v3, %v1048_v15 }
 0x20d   :  { %v1067_v50 = vpop.permute.xlu1 %1066 }
 0x20e   :  { %v1069_v25 = vmul.f32 %v1067_v50, %v1061_v36  ;;  %v1070_v16 = vmul.f32 %v1067_v50, %v1062_v35  ;;  %v1071_v1 = vmul.f32 %v1067_v50, %v1063_v32  ;;  %v1072_v62 = vmul.f32 %v1067_v50, %v1064_v9 }
 0x210   :  { %v2522_v44 = vadd.f32 %v1069_v25, %v1013_v38  ;;  %v2525_v59 = vadd.f32 %v1070_v16, %v2484_v37  ;;  %v2528_v8 = vadd.f32 %v1071_v1, %v2487_v24  ;;  %v2530_v31 = vadd.f32 %v1072_v62, %v1016_v19 }
 0x211   :  { %v1078_v49 = vpop.permute.xlu1 %1077  ;;  %v1046_v37 = vrot.slane %v2268_v17, 4  ;;  %v1045_v24 = vrot.slane %v2266_v46, 4 }
 0x212   :  { %v1088_v7 = vsel %vm1085_vm12, %v1078_v49, %v1080_v21  ;;  %v1089_v33 = vsel %vm1085_vm12, %v1084_v52, %v1078_v49 }
 0x213   :  { %v1102_v23 = vrot.slane %v1088_v7, 2  ;;  %v1105_v14 = vrot.slane %v1089_v33, 2  ;;  %v1053_v17 = vmul.f32 %v2499_v3, %v1045_v24  ;;  %v1054_v46 = vmul.f32 %v2499_v3, %v1046_v37 }
 0x214   :  { %v1137_v62 = vrot.slane %v1089_v33, 6 }
 0x215   :  { %v1110_v38 = vmul.f32 %v1108_v63, %v1102_v23  ;;  %v1113_v12 = vmul.f32 %v1108_v63, %v1105_v14  ;;  %v1082_v22 = vpop.permute.xlu1 %1081 }
 0x216   :  { %v1086_v19 = vsel %vm1085_vm12, %v1082_v22, %v1084_v52  ;;  %v1087_v51 = vsel %vm1085_vm12, %v1080_v21, %v1082_v22 }
 0x217   :  { %v2542_v26 = vadd.f32 %v1110_v38, %v1041_v0  ;;  %v2544_v34 = vadd.f32 %v1113_v12, %v1044_v60  ;;  %v1103_v43 = vrot.slane %v1087_v51, 2  ;;  %v1104_v29 = vrot.slane %v1086_v19, 2 }
 0x218   :  { %v1118_v0 = vrot.slane %v1088_v7, 4  ;;  %v1121_v60 = vrot.slane %v1089_v33, 4  ;;  %v1119_v35 = vrot.slane %v1087_v51, 4  ;;  %v1120_v3 = vrot.slane %v1086_v19, 4 }
 0x219   :  { %v1111_v10 = vmul.f32 %v1108_v63, %v1103_v43  ;;  %v1112_v58 = vmul.f32 %v1108_v63, %v1104_v29  ;;  %v1092_v30 = vpop.permute.xlu1 %1091  ;;  %v1136_v52 = vrot.slane %v1086_v19, 6 }
 0x21a   :  { %v1094_v48 = vmul.f32 %v1092_v30, %v1088_v7  ;;  %v1095_v4 = vmul.f32 %v1092_v30, %v1087_v51  ;;  %v1096_v13 = vmul.f32 %v1092_v30, %v1086_v19  ;;  %v1097_v11 = vmul.f32 %v1092_v30, %v1089_v33  ;;  %v1165_v33 = vpop.permute.xlu0 %1164 }
 0x21b   :  { %v2552_v27 = vadd.f32 %v1111_v10, %v1042_v57  ;;  %v2554_v61 = vadd.f32 %v1112_v58, %v1043_v6  ;;  %v1058_v57 = vadd.f32 %v1054_v46, %v2493_v41  ;;  %v1059_v6 = vadd.f32 %v1055_v39, %v2495_v28 }
 0x21c   :  { %v2557_v53 = vadd.f32 %v1094_v48, %v2505_v2  ;;  %v2560_v42 = vadd.f32 %v1095_v4, %v2507_v54  ;;  %v2563_v47 = vadd.f32 %v1096_v13, %v2509_v5  ;;  %v2566_v21 = vadd.f32 %v1097_v11, %v2511_v18 }
 0x21d   :  { %v1060_v2 = vadd.f32 %v1056_v45, %v2497_v56  ;;  %v1057_v54 = vadd.f32 %v1053_v17, %v2491_v40  ;;  %v1134_v41 = vrot.slane %v1088_v7, 6  ;;  %v1135_v28 = vrot.slane %v1087_v51, 6 }
 0x21e   :  { %v1124_v32 = vpop.permute.xlu1 %1123  ;;  %v1213_v19 = vpop.permute.xlu0 %1212 }
 0x21f   :  { %v1126_v9 = vmul.f32 %v1124_v32, %v1118_v0  ;;  %v1127_v36 = vmul.f32 %v1124_v32, %v1119_v35  ;;  %v1128_v5 = vmul.f32 %v1124_v32, %v1120_v3  ;;  %v1129_v50 = vmul.f32 %v1124_v32, %v1121_v60 }
 0x221   :  { %v2572_v25 = vadd.f32 %v1126_v9, %v1057_v54  ;;  %v2574_v18 = vadd.f32 %v1127_v36, %v1058_v57  ;;  %v2576_v16 = vadd.f32 %v1128_v5, %v1059_v6  ;;  %v2578_v1 = vadd.f32 %v1129_v50, %v1060_v2 }
 0x222   :  { %v1155_v29 = vpop.permute.xlu0 %1154 }
 0x223   :  { %v1140_v56 = vpop.permute.xlu1 %1139 }
 0x224   :  { %v1142_v49 = vmul.f32 %v1140_v56, %v1134_v41  ;;  %v1143_v23 = vmul.f32 %v1140_v56, %v1135_v28  ;;  %v1144_v40 = vmul.f32 %v1140_v56, %v1136_v52  ;;  %v1145_v14 = vmul.f32 %v1140_v56, %v1137_v62 }
 0x226   :  { %v1146_v63 = vadd.f32 %v1142_v49, %v2522_v44  ;;  %v1147_v38 = vadd.f32 %v1143_v23, %v2525_v59  ;;  %v2583_v12 = vadd.f32 %v1144_v40, %v2528_v8  ;;  %v2586_v22 = vadd.f32 %v1145_v14, %v2530_v31  ;;  %v2590_v15 = vpop.permute.xlu0 %1237 }
 0x228   :  { %v1181_v37 = vpop.permute.xlu1 %1180 }
 0x22a   :  { %v2595_v17 = vpop.permute.xlu0 %1285 }
 0x22d   :  { %v1197_v7 = vpop.permute.xlu1 %1196 }
 0x22e   :  { %v1228_v32 = vpop.permute.xlu0 %1227 }
 0x231   :  { %v1151_v24 = vpop.permute.xlu1 %1150 }
 0x235   :  { %v1153_v51 = vpop.permute.xlu1 %1152 }
 0x236   :  { %v1160_v59 = vsel %vm1158_vm13, %v1153_v51, %v1155_v29  ;;  %v1161_v8 = vsel %vm1158_vm13, %v1151_v24, %v1153_v51 }
 0x237   :  { %v1175_v46 = vrot.slane %v1161_v8, 2  ;;  %v1176_v10 = vrot.slane %v1160_v59, 2  ;;  %v1191_v48 = vrot.slane %v1161_v8, 4  ;;  %v1192_v4 = vrot.slane %v1160_v59, 4 }
 0x238   :  { %v1207_v13 = vrot.slane %v1161_v8, 6  ;;  %v1208_v11 = vrot.slane %v1160_v59, 6  ;;  %v1167_v39 = vmul.f32 %v1165_v33, %v1161_v8  ;;  %v1168_v45 = vmul.f32 %v1165_v33, %v1160_v59 }
 0x239   :  { %v1157_v43 = vpop.permute.xlu1 %1156  ;;  %v1183_v3 = vmul.f32 %v1181_v37, %v1175_v46  ;;  %v1184_v57 = vmul.f32 %v1181_v37, %v1176_v10  ;;  %v1199_v54 = vmul.f32 %v1197_v7, %v1191_v48  ;;  %v1200_v9 = vmul.f32 %v1197_v7, %v1192_v4 }
 0x23a   :  { %v1159_v58 = vsel %vm1158_vm13, %v1155_v29, %v1157_v43  ;;  %v1162_v30 = vsel %vm1158_vm13, %v1157_v43, %v1151_v24  ;;  %v1215_v36 = vmul.f32 %v1213_v19, %v1207_v13  ;;  %v1216_v5 = vmul.f32 %v1213_v19, %v1208_v11 }
 0x23b   :  { %v1177_v60 = vrot.slane %v1159_v58, 2  ;;  %v1178_v35 = vrot.slane %v1162_v30, 2  ;;  %v1193_v6 = vrot.slane %v1159_v58, 4  ;;  %v1194_v2 = vrot.slane %v1162_v30, 4 }
 0x23c   :  { %v2599_v50 = vadd.f32 %v1167_v39, %v2557_v53  ;;  %v2602_v41 = vadd.f32 %v1168_v45, %v2560_v42  ;;  %v1209_v62 = vrot.slane %v1159_v58, 6  ;;  %v1210_v28 = vrot.slane %v1162_v30, 6 }
 0x23d   :  { %v2588_v20 = vpop.permute.xlu1 %1253  ;;  %v1169_v56 = vmul.f32 %v1165_v33, %v1159_v58  ;;  %v1170_v49 = vmul.f32 %v1165_v33, %v1162_v30  ;;  %v1185_v23 = vmul.f32 %v1181_v37, %v1177_v60  ;;  %v1186_v40 = vmul.f32 %v1181_v37, %v1178_v35 }
 0x23e   :  { %v1187_v14 = vadd.f32 %v1183_v3, %v2542_v26  ;;  %v1188_v24 = vadd.f32 %v1184_v57, %v2552_v27  ;;  %v1201_v51 = vmul.f32 %v1197_v7, %v1193_v6  ;;  %v1202_v43 = vmul.f32 %v1197_v7, %v1194_v2  ;;  %v2614_v26 = vpop.permute.xlu0 %1310 }
 0x23f   :  { %v1203_v29 = vadd.f32 %v1199_v54, %v2572_v25  ;;  %v1204_v53 = vadd.f32 %v1200_v9, %v2574_v18  ;;  %v1219_v59 = vadd.f32 %v1215_v36, %v1146_v63  ;;  %v1220_v42 = vadd.f32 %v1216_v5, %v1147_v38 }
 0x240   :  { %v1217_v8 = vmul.f32 %v1213_v19, %v1209_v62  ;;  %v1218_v46 = vmul.f32 %v1213_v19, %v1210_v28  ;;  %v1173_v27 = vadd.f32 %v1169_v56, %v2563_v47  ;;  %v1174_v25 = vadd.f32 %v1170_v49, %v2566_v21 }
 0x241   :  { %v1189_v18 = vadd.f32 %v1185_v23, %v2554_v61  ;;  %v1190_v63 = vadd.f32 %v1186_v40, %v2544_v34  ;;  %v1205_v38 = vadd.f32 %v1201_v51, %v2576_v16  ;;  %v1206_v7 = vadd.f32 %v1202_v43, %v2578_v1 }
 0x242   :  { %v2593_v44 = vpop.permute.xlu1 %1269  ;;  %v1221_v61 = vadd.f32 %v1217_v8, %v2583_v12  ;;  %v1222_v34 = vadd.f32 %v1218_v46, %v2586_v22  ;;  %v2633_v3 = vpop.permute.xlu0 %1358 }
 0x246   :  { %v1224_v31 = vpop.permute.xlu1 %1223 }
 0x24a   :  { %v1226_v0 = vpop.permute.xlu1 %1225 }
 0x24b   :  { %v1233_v10 = vsel %vm1231_vm14, %v1226_v0, %v1228_v32  ;;  %v1234_v37 = vsel %vm1231_vm14, %v1224_v31, %v1226_v0 }
 0x24c   :  { %v1248_v30 = vrot.slane %v1234_v37, 2  ;;  %v1249_v48 = vrot.slane %v1233_v10, 2  ;;  %v1264_v4 = vrot.slane %v1234_v37, 4  ;;  %v1265_v47 = vrot.slane %v1233_v10, 4 }
 0x24d   :  { %v1280_v21 = vrot.slane %v1234_v37, 6  ;;  %v1281_v16 = vrot.slane %v1233_v10, 6  ;;  %v1241_v0 = vmul.f32 %v2590_v15, %v1233_v10 }
 0x24e   :  { %v1230_v52 = vpop.permute.xlu1 %1229  ;;  %v1256_v12 = vmul.f32 %v2588_v20, %v1248_v30  ;;  %v1257_v22 = vmul.f32 %v2588_v20, %v1249_v48  ;;  %v1272_v57 = vmul.f32 %v2593_v44, %v1264_v4  ;;  %v1273_v6 = vmul.f32 %v2593_v44, %v1265_v47 }
 0x24f   :  { %v1232_v19 = vsel %vm1231_vm14, %v1228_v32, %v1230_v52  ;;  %v1235_v58 = vsel %vm1231_vm14, %v1230_v52, %v1224_v31  ;;  %v1240_v31 = vmul.f32 %v2590_v15, %v1234_v37  ;;  %v1288_v2 = vmul.f32 %v2595_v17, %v1280_v21 }
 0x250   :  { %v1250_v13 = vrot.slane %v1232_v19, 2  ;;  %v1251_v1 = vrot.slane %v1235_v58, 2  ;;  %v1266_v11 = vrot.slane %v1232_v19, 4  ;;  %v1267_v39 = vrot.slane %v1235_v58, 4 }
 0x251   :  { %v1282_v60 = vrot.slane %v1232_v19, 6  ;;  %v1283_v35 = vrot.slane %v1235_v58, 6  ;;  %v1289_v32 = vmul.f32 %v2595_v17, %v1281_v16  ;;  %v1242_v54 = vmul.f32 %v2590_v15, %v1232_v19  ;;  %v1301_v19 = vpop.permute.xlu0 %1300 }
 0x252   :  { %v2612_v33 = vpop.permute.xlu1 %1326  ;;  %v1243_v9 = vmul.f32 %v2590_v15, %v1235_v58  ;;  %v1258_v36 = vmul.f32 %v2588_v20, %v1250_v13  ;;  %v1259_v5 = vmul.f32 %v2588_v20, %v1251_v1  ;;  %v1274_v62 = vmul.f32 %v2593_v44, %v1266_v11 }
 0x253   :  { %v1275_v28 = vmul.f32 %v2593_v44, %v1267_v39  ;;  %v1244_v56 = vadd.f32 %v1240_v31, %v2599_v50  ;;  %v1245_v49 = vadd.f32 %v1241_v0, %v2602_v41  ;;  %v1290_v23 = vmul.f32 %v2595_v17, %v1282_v60 }
 0x254   :  { %v1291_v40 = vmul.f32 %v2595_v17, %v1283_v35  ;;  %v1260_v51 = vadd.f32 %v1256_v12, %v1187_v14  ;;  %v1261_v43 = vadd.f32 %v1257_v22, %v1188_v24  ;;  %v1276_v15 = vadd.f32 %v1272_v57, %v1203_v29 }
 0x255   :  { %v1277_v8 = vadd.f32 %v1273_v6, %v1204_v53  ;;  %v1292_v46 = vadd.f32 %v1288_v2, %v1219_v59  ;;  %v1293_v10 = vadd.f32 %v1289_v32, %v1220_v42  ;;  %v1246_v20 = vadd.f32 %v1242_v54, %v1173_v27 }
 0x256   :  { %v1247_v37 = vadd.f32 %v1243_v9, %v1174_v25  ;;  %v1262_v58 = vadd.f32 %v1258_v36, %v1189_v18  ;;  %v1263_v44 = vadd.f32 %v1259_v5, %v1190_v63  ;;  %v1278_v30 = vadd.f32 %v1274_v62, %v1205_v38 }
 0x257   :  { %v2629_v45 = vpop.permute.xlu1 %1342  ;;  %v1279_v48 = vadd.f32 %v1275_v28, %v1206_v7  ;;  %v1294_v4 = vadd.f32 %v1290_v23, %v1221_v61  ;;  %v1295_v41 = vadd.f32 %v1291_v40, %v1222_v34 }
 0x25b   :  { %v1297_v52 = vpop.permute.xlu1 %1296 }
 0x25f   :  { %v1299_v50 = vpop.permute.xlu1 %1298 }
 0x260   :  { %v1306_v47 = vsel %vm1304_vm15, %v1299_v50, %v1301_v19  ;;  %v1307_v17 = vsel %vm1304_vm15, %v1297_v52, %v1299_v50 }
 0x261   :  { %v1313_v14 = vmul.f32 %v2614_v26, %v1307_v17  ;;  %v1314_v24 = vmul.f32 %v2614_v26, %v1306_v47  ;;  %v1321_v29 = vrot.slane %v1307_v17, 2  ;;  %v1322_v53 = vrot.slane %v1306_v47, 2 }
 0x262   :  { %v1337_v59 = vrot.slane %v1307_v17, 4  ;;  %v1338_v42 = vrot.slane %v1306_v47, 4  ;;  %v1353_v27 = vrot.slane %v1307_v17, 6  ;;  %v1354_v25 = vrot.slane %v1306_v47, 6 }
 0x263   :  { %v1317_v18 = vadd.f32 %v1313_v14, %v1244_v56  ;;  %v1318_v63 = vadd.f32 %v1314_v24, %v1245_v49  ;;  %v1329_v38 = vmul.f32 %v2612_v33, %v1321_v29  ;;  %v1330_v7 = vmul.f32 %v2612_v33, %v1322_v53  ;;  %v1303_v61 = vpop.permute.xlu1 %1302  ;;  %v1385_v14 = vpop.permute.xlu0 %1384 }
 0x264   :  { %v1345_v34 = vmul.f32 %v2629_v45, %v1337_v59  ;;  %v1346_v21 = vmul.f32 %v2629_v45, %v1338_v42  ;;  %v1361_v16 = vmul.f32 %v2633_v3, %v1353_v27  ;;  %v1362_v13 = vmul.f32 %v2633_v3, %v1354_v25 }
 0x265   :  { %v1305_v1 = vsel %vm1304_vm15, %v1301_v19, %v1303_v61  ;;  %v1308_v11 = vsel %vm1304_vm15, %v1303_v61, %v1297_v52  ;;  %v1333_v39 = vadd.f32 %v1329_v38, %v1260_v51  ;;  %v1334_v31 = vadd.f32 %v1330_v7, %v1261_v43 }
 0x266   :  { %v1315_v0 = vmul.f32 %v2614_v26, %v1305_v1  ;;  %v1316_v60 = vmul.f32 %v2614_v26, %v1308_v11  ;;  %v1323_v35 = vrot.slane %v1305_v1, 2  ;;  %v1324_v12 = vrot.slane %v1308_v11, 2 }
 0x267   :  { %v1339_v22 = vrot.slane %v1305_v1, 4  ;;  %v1340_v57 = vrot.slane %v1308_v11, 4  ;;  %v1355_v6 = vrot.slane %v1305_v1, 6  ;;  %v1356_v2 = vrot.slane %v1308_v11, 6 }
 0x268   :  { %v1319_v32 = vadd.f32 %v1315_v0, %v1246_v20  ;;  %v1320_v54 = vadd.f32 %v1316_v60, %v1247_v37  ;;  %v1331_v9 = vmul.f32 %v2612_v33, %v1323_v35  ;;  %v1332_v36 = vmul.f32 %v2612_v33, %v1324_v12 }
 0x269   :  { %v1347_v55 = vmul.f32 %v2629_v45, %v1339_v22  ;;  %v1348_v5 = vmul.f32 %v2629_v45, %v1340_v57  ;;  %v1363_v62 = vmul.f32 %v2633_v3, %v1355_v6  ;;  %v1364_v26 = vmul.f32 %v2633_v3, %v1356_v2 }
 0x26a   :  { %v1335_v28 = vadd.f32 %v1331_v9, %v1262_v58  ;;  %v1336_v52 = vadd.f32 %v1332_v36, %v1263_v44  ;;  %v1349_v56 = vadd.f32 %v1345_v34, %v1276_v15  ;;  %v1350_v49 = vadd.f32 %v1346_v21, %v1277_v8 }
 0x26b   :  { %v1351_v23 = vadd.f32 %v1347_v55, %v1278_v30  ;;  %v1352_v40 = vadd.f32 %v1348_v5, %v1279_v48  ;;  %v1365_v51 = vadd.f32 %v1361_v16, %v1292_v46  ;;  %v1366_v43 = vadd.f32 %v1362_v13, %v1293_v10 }
 0x26c   :  { %v1367_v20 = vadd.f32 %v1363_v62, %v1294_v4  ;;  %v1368_v37 = vadd.f32 %v1364_v26, %v1295_v41  ;;  %v1369_v19 = vadd.f32 %v1333_v39, %v1317_v18  ;;  %v1370_v33 = vadd.f32 %v1334_v31, %v1318_v63 }
 0x26d   :  { %v1371_v50 = vadd.f32 %v1335_v28, %v1319_v32  ;;  %v1372_v47 = vadd.f32 %v1336_v52, %v1320_v54  ;;  %v1373_v17 = vadd.f32 %v1365_v51, %v1349_v56  ;;  %v1374_v45 = vadd.f32 %v1366_v43, %v1350_v49 }
 0x26e   :  { %v1375_v24 = vadd.f32 %v1367_v20, %v1351_v23  ;;  %v1376_v29 = vadd.f32 %v1368_v37, %v1352_v40 }
 0x26f   :  { %v1377_v3 = vadd.f32 %v1373_v17, %v1369_v19  ;;  %v1378_v58 = vadd.f32 %v1374_v45, %v1370_v33 }
 0x270   :  { %v1379_v44 = vadd.f32 %v1375_v24, %v1371_v50  ;;  %v1380_v15 = vadd.f32 %v1376_v29, %v1372_v47 }
 0x271   :  { %v1387_v8 = vadd.f32 %v1385_v14, %v1377_v3  ;;  %v1388_v30 = vadd.f32 %v1385_v14, %v1378_v58 }
 0x272   :  { %v1389_v48 = vadd.f32 %v1385_v14, %v1379_v44  ;;  %v1390_v46 = vadd.f32 %v1385_v14, %v1380_v15 }
 0x273   :  { %1391 = vst [vmem:[%s2693_s6] sm:$0xff] %v1387_v8  ;;  %1392 = vst [vmem:[%s2693_s6 + $0x8] sm:$0xff] %v1388_v30 }
 0x274   :  { %1393 = vst [vmem:[%s2693_s6 + $0x10] sm:$0xff] %v1389_v48  ;;  %1394 = vst [vmem:[%s2693_s6 + $0x18] sm:$0xff] %v1390_v46 }

</bundles_post_ra>
